<compile_context>
chip_gen: v7x
topology: tpu7x:2x2x1
jax: 0.10.0
libtpu: 0.0.40
codegen_flags: <defaults>
</compile_context>

<pallas_src>
import functools

import numpy as np
import jax
import jax.numpy as jnp
from jax.experimental import pallas as pl
from jax.experimental.pallas import tpu as pltpu

REG_STRENGTH = 0.1
_F32_MAX = float(np.finfo(np.float32).max)   # plain Python float -> jaxpr literal
_LANE = 128


def _uniform_matching_kernel(x_row_ref, x_col_ref, o_ref, *, n, reg_strength):
    """x_row_ref: (1, N) f32, x_col_ref: (N, 1) f32 (same data); o_ref: (1, 1) f32 in SMEM."""
    N = x_row_ref.shape[1]
    f32 = jnp.float32
    n_f = float(n)
    inv_eps = 1.0 / float(reg_strength)

    # ---- 1-D index iotas only (no (N,N) iota / int->float casts) ------------
    lane_i = jax.lax.broadcasted_iota(jnp.int32, (1, N), 1)     # (1,N)  k / element j
    sub_i = jax.lax.broadcasted_iota(jnp.int32, (N, 1), 0)      # (N,1)  j / element i
    lane_f = lane_i.astype(f32)
    sub_f = sub_i.astype(f32)
    lane_valid = lane_i < n                                     # (1,N)
    sub_valid = sub_i < n                                       # (N,1)

    t_row = -x_row_ref[...]                                     # (1,N)   t = -x
    t_col = -x_col_ref[...]                                     # (N,1)

    # ---- stable descending rank, single (N,N) pass ---------------------------
    # before[i, j] = 1{t_j > t_i  or (t_j == t_i and j < i)}  (j real)
    before = ((t_row > t_col) | ((t_row == t_col) & (lane_i < sub_i))) & lane_valid
    rank_col = jnp.sum(before.astype(jnp.int32), axis=1, keepdims=True)   # (N,1)

    # ---- prefix sums of descending-sorted t -----------------------------------
    # scs_row[k] = sum_{m<=k} s[m] = sum_i t_i * 1{rank_i <= k}
    p_incl = ((rank_col <= lane_i) & sub_valid).astype(f32)     # (N,N)
    scs_row = jnp.sum(t_col * p_incl, axis=0, keepdims=True)    # (1,N)  full f32 accum
    # exclusive prefix as a column: scs_excl_col[j] = scs_row[j-1], 0 at j = 0
    # (the shift is folded into the selection matrix k == j-1; no transpose)
    scs_excl_col = jnp.sum(jnp.where(lane_i == sub_i - 1, scs_row, 0.0),
                           axis=1, keepdims=True)               # (N,1)

    # ---- segment means of y = w - s over sorted positions [j..k] --------------
    # mean(w[j..k]) = (n - (j+k)/2)/eps      (separable column + row terms)
    # mean(s[j..k]) = (scs[k] - scs_excl[j]) / (k - j + 1)
    seg_len = jnp.maximum(lane_f - sub_f + 1.0, 1.0)
    inv_len = pl.reciprocal(seg_len, approx=True)               # EUP slot (VALU is binding)
    inv_len = inv_len * (2.0 - seg_len * inv_len)               # one Newton step
    col_term = (n_f - 0.5 * sub_f) * inv_eps                    # (N,1)
    row_term = (-0.5 * inv_eps) * lane_f                        # (1,N)
    segmean = (col_term + row_term) - (scs_row - scs_excl_col) * inv_len
    segmean = jnp.where(lane_valid, segmean, -_F32_MAX)         # mask padded k

    # ---- R[j, i] = max_{k>=i} segmean[j, k]  (reverse running max, log steps) -
    R = segmean
    s = 1
    while s < N:
        # roll by (N - s) == roll by -s: pulls segmean[:, m + s] into lane m
        shifted = jnp.where(lane_i < N - s,
                            pltpu.roll(R, shift=N - s, axis=1),
                            -_F32_MAX)
        R = jnp.maximum(R, shifted)
        s *= 2

    # ---- isotonic (non-increasing, L2) closed form: sol_i = min_{j<=i} R[j, i]
    sol = jnp.min(jnp.where(sub_i <= lane_i, R, _F32_MAX), axis=0, keepdims=True)

    # ---- soft-sorted (ascending) x and the uniform-matching loss --------------
    w = (n_f - lane_f) * inv_eps                                # w[i] = (n - i)/eps
    x_sorted = sol - w
    i_seq = (lane_f + 1.0) * (1.0 / n_f)
    diff = jnp.where(lane_valid, jnp.abs(i_seq - x_sorted), 0.0)
    o_ref[0, 0] = jnp.max(diff)


def _vmem_limit_bytes(N):
    """Scoped-VMEM request: ~6 live f32 (N,N) slabs + bool/int temps + headroom."""
    est = 10 * N * N * 4 + (4 << 20)
    try:
        phys = pltpu.get_tpu_info().vmem_capacity_bytes
    except Exception:
        phys = 64 << 20                    # assume the most restrictive (v7x) part
    cap = min(100 << 20, (phys * 3) // 4)  # ~48 MiB on v7x, ~96 MiB on v5e/v6e
    return int(max(32 << 20, min(cap, est)))


def uniform_matching_loss(x, reg_strength=REG_STRENGTH):
    """UniformMatchingLoss.forward(x) for a 1-D vector x of conformity scores."""
    x = jnp.asarray(x, jnp.float32).reshape(-1)
    n = int(x.shape[0])
    if n == 0:
        return jnp.float32(0.0)

    # Lane-dense padding to a multiple of 128 (padding is masked in-kernel).
    N = max(_LANE, ((n + _LANE - 1) // _LANE) * _LANE)
    x_pad = jnp.pad(x, (0, N - n))
    x_row = x_pad.reshape(1, N)
    x_col = x_pad.reshape(N, 1)   # column copy (byte-identical) -> no in-kernel transpose

    kernel = functools.partial(
        _uniform_matching_kernel, n=n, reg_strength=float(reg_strength))
    out = pl.pallas_call(
        kernel,
        out_shape=jax.ShapeDtypeStruct((1, 1), jnp.float32),
        in_specs=[
            pl.BlockSpec(memory_space=pltpu.MemorySpace.VMEM),
            pl.BlockSpec(memory_space=pltpu.MemorySpace.VMEM),
        ],
        out_specs=pl.BlockSpec(memory_space=pltpu.MemorySpace.SMEM),
        compiler_params=pltpu.CompilerParams(vmem_limit_bytes=_vmem_limit_bytes(N)),
    )(x_row, x_col)
    return out[0, 0]


# ------------------------------ numpy reference ------------------------------
def _isotonic_l2_nonincr_np(y):
    """PAV: argmin_{v non-increasing} ||v - y||^2."""
    vals, wts = [], []
    for v in np.asarray(y, np.float64):
        vals.append(float(v)); wts.append(1.0)
        while len(vals) > 1 and vals[-2] < vals[-1]:
            v2, w2 = vals.pop(), wts.pop()
            v1, w1 = vals.pop(), wts.pop()
            vals.append((v1 * w1 + v2 * w2) / (w1 + w2)); wts.append(w1 + w2)
    out = []
    for v, wt in zip(vals, wts):
        out.extend([v] * int(round(wt)))
    return np.array(out)


def _ref_loss(x_np, eps=REG_STRENGTH):
    n = len(x_np)
    t = -np.asarray(x_np, np.float64)
    s = np.sort(t)[::-1]
    w = np.arange(n, 0, -1, dtype=np.float64) / eps
    sol = _isotonic_l2_nonincr_np(w - s)
    x_sorted = sol - w
    i_seq = np.arange(1, n + 1, dtype=np.float64) / n
    return float(np.max(np.abs(i_seq - x_sorted)))


if __name__ == "__main__":
    key = jax.random.PRNGKey(0)
    n = 8
    x = jax.random.uniform(key, (n,), dtype=jnp.float32)   # conformity scores in [0, 1)

    loss = uniform_matching_loss(x)
    jax.block_until_ready(loss)

    ref = _ref_loss(np.asarray(x))
    # f32 kernel vs float64 reference: expected mismatch well below 1e-4 at n=8, eps=0.1.
    np.testing.assert_allclose(np.asarray(loss), ref, rtol=1e-4, atol=3e-4)
    print("KERNEL_OK")
</pallas_src>

<mosaic_0001>
module attributes {stable_mosaic.version = 11 : i64} {
  func.func @_uniform_matching_kernel(%arg0: memref<1x128xf32, #tpu.memory_space<vmem>>, %arg1: memref<128x1xf32, #tpu.memory_space<vmem>>, %arg2: memref<1x1xf32, #tpu.memory_space<smem>>) attributes {dimension_semantics = [], scalar_prefetch = 0 : i64, scratch_operands = 0 : i64, tpu.core_type = #tpu.core_type<tc>} {
    %0 = tpu.iota {dimensions = array<i32: 1>} : vector<1x128xi32>
    %1 = tpu.iota {dimensions = array<i32: 0>} : vector<128x1xi32>
    %2 = arith.sitofp %0 : vector<1x128xi32> to vector<1x128xf32>
    %3 = arith.sitofp %1 : vector<128x1xi32> to vector<128x1xf32>
    %c8_i32 = arith.constant 8 : i32
    %4 = vector.broadcast %c8_i32 : i32 to vector<1x128xi32>
    %5 = arith.cmpi slt, %0, %4 : vector<1x128xi32>
    %c8_i32_0 = arith.constant 8 : i32
    %6 = vector.broadcast %c8_i32_0 : i32 to vector<128x1xi32>
    %7 = arith.cmpi slt, %1, %6 : vector<128x1xi32>
    %c0 = arith.constant 0 : index
    %c0_1 = arith.constant 0 : index
    %8 = vector.load %arg0[%c0, %c0_1] : memref<1x128xf32, #tpu.memory_space<vmem>>, vector<1x128xf32>
    %cst = arith.constant 0.000000e+00 : f32
    %9 = vector.broadcast %cst : f32 to vector<1x128xf32>
    %10 = arith.subf %9, %8 : vector<1x128xf32>
    %c0_2 = arith.constant 0 : index
    %c0_3 = arith.constant 0 : index
    %11 = vector.load %arg1[%c0_2, %c0_3] : memref<128x1xf32, #tpu.memory_space<vmem>>, vector<128x1xf32>
    %cst_4 = arith.constant 0.000000e+00 : f32
    %12 = vector.broadcast %cst_4 : f32 to vector<128x1xf32>
    %13 = arith.subf %12, %11 : vector<128x1xf32>
    %14 = vector.broadcast %10 : vector<1x128xf32> to vector<128x128xf32>
    %15 = vector.broadcast %13 : vector<128x1xf32> to vector<128x128xf32>
    %16 = arith.cmpf ogt, %14, %15 : vector<128x128xf32>
    %17 = vector.broadcast %10 : vector<1x128xf32> to vector<128x128xf32>
    %18 = vector.broadcast %13 : vector<128x1xf32> to vector<128x128xf32>
    %19 = arith.cmpf oeq, %17, %18 : vector<128x128xf32>
    %20 = vector.broadcast %0 : vector<1x128xi32> to vector<128x128xi32>
    %21 = vector.broadcast %1 : vector<128x1xi32> to vector<128x128xi32>
    %22 = arith.cmpi slt, %20, %21 : vector<128x128xi32>
    %23 = arith.andi %19, %22 : vector<128x128xi1>
    %24 = arith.ori %16, %23 : vector<128x128xi1>
    %25 = vector.broadcast %5 : vector<1x128xi1> to vector<128x128xi1>
    %26 = arith.andi %24, %25 : vector<128x128xi1>
    %27 = arith.extui %26 : vector<128x128xi1> to vector<128x128xi32>
    %cst_5 = arith.constant dense<0> : vector<128xi32>
    %28 = vector.multi_reduction <add>, %27, %cst_5 [1] : vector<128x128xi32> to vector<128xi32>
    %29 = vector.shape_cast %28 : vector<128xi32> to vector<128x1xi32>
    %30 = vector.broadcast %29 : vector<128x1xi32> to vector<128x128xi32>
    %31 = vector.broadcast %0 : vector<1x128xi32> to vector<128x128xi32>
    %32 = arith.cmpi sle, %30, %31 : vector<128x128xi32>
    %33 = vector.broadcast %7 : vector<128x1xi1> to vector<128x128xi1>
    %34 = arith.andi %32, %33 : vector<128x128xi1>
    %35 = arith.extui %34 : vector<128x128xi1> to vector<128x128xi32>
    %36 = arith.sitofp %35 : vector<128x128xi32> to vector<128x128xf32>
    %37 = vector.broadcast %13 : vector<128x1xf32> to vector<128x128xf32>
    %38 = arith.mulf %37, %36 : vector<128x128xf32>
    %cst_6 = arith.constant dense<0.000000e+00> : vector<128xf32>
    %39 = vector.multi_reduction <add>, %38, %cst_6 [0] : vector<128x128xf32> to vector<128xf32>
    %40 = vector.shape_cast %39 : vector<128xf32> to vector<1x128xf32>
    %c1_i32 = arith.constant 1 : i32
    %41 = vector.broadcast %c1_i32 : i32 to vector<128x1xi32>
    %42 = arith.subi %1, %41 : vector<128x1xi32>
    %43 = vector.broadcast %0 : vector<1x128xi32> to vector<128x128xi32>
    %44 = vector.broadcast %42 : vector<128x1xi32> to vector<128x128xi32>
    %45 = arith.cmpi eq, %43, %44 : vector<128x128xi32>
    %cst_7 = arith.constant 0.000000e+00 : f32
    %46 = vector.shape_cast %40 : vector<1x128xf32> to vector<1x128xf32>
    %47 = vector.broadcast %46 : vector<1x128xf32> to vector<128x128xf32>
    %48 = vector.broadcast %cst_7 : f32 to vector<128x128xf32>
    %49 = arith.select %45, %47, %48 : vector<128x128xi1>, vector<128x128xf32>
    %cst_8 = arith.constant dense<0.000000e+00> : vector<128xf32>
    %50 = vector.multi_reduction <add>, %49, %cst_8 [1] : vector<128x128xf32> to vector<128xf32>
    %51 = vector.shape_cast %50 : vector<128xf32> to vector<128x1xf32>
    %52 = vector.broadcast %2 : vector<1x128xf32> to vector<128x128xf32>
    %53 = vector.broadcast %3 : vector<128x1xf32> to vector<128x128xf32>
    %54 = arith.subf %52, %53 : vector<128x128xf32>
    %cst_9 = arith.constant 1.000000e+00 : f32
    %55 = vector.broadcast %cst_9 : f32 to vector<128x128xf32>
    %56 = arith.addf %54, %55 : vector<128x128xf32>
    %cst_10 = arith.constant 1.000000e+00 : f32
    %57 = vector.broadcast %cst_10 : f32 to vector<128x128xf32>
    %58 = arith.maximumf %56, %57 : vector<128x128xf32>
    %59 = tpu.reciprocal %58 {approx = true} : vector<128x128xf32> -> vector<128x128xf32>
    %60 = arith.mulf %58, %59 : vector<128x128xf32>
    %cst_11 = arith.constant 2.000000e+00 : f32
    %61 = vector.broadcast %cst_11 : f32 to vector<128x128xf32>
    %62 = arith.subf %61, %60 : vector<128x128xf32>
    %63 = arith.mulf %59, %62 : vector<128x128xf32>
    %cst_12 = arith.constant 5.000000e-01 : f32
    %64 = vector.broadcast %cst_12 : f32 to vector<128x1xf32>
    %65 = arith.mulf %64, %3 : vector<128x1xf32>
    %cst_13 = arith.constant 8.000000e+00 : f32
    %66 = vector.broadcast %cst_13 : f32 to vector<128x1xf32>
    %67 = arith.subf %66, %65 : vector<128x1xf32>
    %cst_14 = arith.constant 1.000000e+01 : f32
    %68 = vector.broadcast %cst_14 : f32 to vector<128x1xf32>
    %69 = arith.mulf %67, %68 : vector<128x1xf32>
    %cst_15 = arith.constant -5.000000e+00 : f32
    %70 = vector.broadcast %cst_15 : f32 to vector<1x128xf32>
    %71 = arith.mulf %70, %2 : vector<1x128xf32>
    %72 = vector.broadcast %69 : vector<128x1xf32> to vector<128x128xf32>
    %73 = vector.broadcast %71 : vector<1x128xf32> to vector<128x128xf32>
    %74 = arith.addf %72, %73 : vector<128x128xf32>
    %75 = vector.broadcast %40 : vector<1x128xf32> to vector<128x128xf32>
    %76 = vector.broadcast %51 : vector<128x1xf32> to vector<128x128xf32>
    %77 = arith.subf %75, %76 : vector<128x128xf32>
    %78 = arith.mulf %77, %63 : vector<128x128xf32>
    %79 = arith.subf %74, %78 : vector<128x128xf32>
    %cst_16 = arith.constant -3.40282347E+38 : f32
    %80 = vector.shape_cast %5 : vector<1x128xi1> to vector<1x128xi1>
    %81 = vector.broadcast %80 : vector<1x128xi1> to vector<128x128xi1>
    %82 = vector.broadcast %cst_16 : f32 to vector<128x128xf32>
    %83 = arith.select %81, %79, %82 : vector<128x128xi1>, vector<128x128xf32>
    %c127_i32 = arith.constant 127 : i32
    %84 = vector.broadcast %c127_i32 : i32 to vector<1x128xi32>
    %85 = arith.cmpi slt, %0, %84 : vector<1x128xi32>
    %c127_i32_17 = arith.constant 127 : i32
    %86 = tpu.dynamic_rotate %83 by %c127_i32_17 dim 1 : vector<128x128xf32>, i32 -> vector<128x128xf32>
    %cst_18 = arith.constant -3.40282347E+38 : f32
    %87 = vector.shape_cast %85 : vector<1x128xi1> to vector<1x128xi1>
    %88 = vector.broadcast %87 : vector<1x128xi1> to vector<128x128xi1>
    %89 = vector.broadcast %cst_18 : f32 to vector<128x128xf32>
    %90 = arith.select %88, %86, %89 : vector<128x128xi1>, vector<128x128xf32>
    %91 = arith.maximumf %83, %90 : vector<128x128xf32>
    %c126_i32 = arith.constant 126 : i32
    %92 = vector.broadcast %c126_i32 : i32 to vector<1x128xi32>
    %93 = arith.cmpi slt, %0, %92 : vector<1x128xi32>
    %c126_i32_19 = arith.constant 126 : i32
    %94 = tpu.dynamic_rotate %91 by %c126_i32_19 dim 1 : vector<128x128xf32>, i32 -> vector<128x128xf32>
    %cst_20 = arith.constant -3.40282347E+38 : f32
    %95 = vector.shape_cast %93 : vector<1x128xi1> to vector<1x128xi1>
    %96 = vector.broadcast %95 : vector<1x128xi1> to vector<128x128xi1>
    %97 = vector.broadcast %cst_20 : f32 to vector<128x128xf32>
    %98 = arith.select %96, %94, %97 : vector<128x128xi1>, vector<128x128xf32>
    %99 = arith.maximumf %91, %98 : vector<128x128xf32>
    %c124_i32 = arith.constant 124 : i32
    %100 = vector.broadcast %c124_i32 : i32 to vector<1x128xi32>
    %101 = arith.cmpi slt, %0, %100 : vector<1x128xi32>
    %c124_i32_21 = arith.constant 124 : i32
    %102 = tpu.dynamic_rotate %99 by %c124_i32_21 dim 1 : vector<128x128xf32>, i32 -> vector<128x128xf32>
    %cst_22 = arith.constant -3.40282347E+38 : f32
    %103 = vector.shape_cast %101 : vector<1x128xi1> to vector<1x128xi1>
    %104 = vector.broadcast %103 : vector<1x128xi1> to vector<128x128xi1>
    %105 = vector.broadcast %cst_22 : f32 to vector<128x128xf32>
    %106 = arith.select %104, %102, %105 : vector<128x128xi1>, vector<128x128xf32>
    %107 = arith.maximumf %99, %106 : vector<128x128xf32>
    %c120_i32 = arith.constant 120 : i32
    %108 = vector.broadcast %c120_i32 : i32 to vector<1x128xi32>
    %109 = arith.cmpi slt, %0, %108 : vector<1x128xi32>
    %c120_i32_23 = arith.constant 120 : i32
    %110 = tpu.dynamic_rotate %107 by %c120_i32_23 dim 1 : vector<128x128xf32>, i32 -> vector<128x128xf32>
    %cst_24 = arith.constant -3.40282347E+38 : f32
    %111 = vector.shape_cast %109 : vector<1x128xi1> to vector<1x128xi1>
    %112 = vector.broadcast %111 : vector<1x128xi1> to vector<128x128xi1>
    %113 = vector.broadcast %cst_24 : f32 to vector<128x128xf32>
    %114 = arith.select %112, %110, %113 : vector<128x128xi1>, vector<128x128xf32>
    %115 = arith.maximumf %107, %114 : vector<128x128xf32>
    %c112_i32 = arith.constant 112 : i32
    %116 = vector.broadcast %c112_i32 : i32 to vector<1x128xi32>
    %117 = arith.cmpi slt, %0, %116 : vector<1x128xi32>
    %c112_i32_25 = arith.constant 112 : i32
    %118 = tpu.dynamic_rotate %115 by %c112_i32_25 dim 1 : vector<128x128xf32>, i32 -> vector<128x128xf32>
    %cst_26 = arith.constant -3.40282347E+38 : f32
    %119 = vector.shape_cast %117 : vector<1x128xi1> to vector<1x128xi1>
    %120 = vector.broadcast %119 : vector<1x128xi1> to vector<128x128xi1>
    %121 = vector.broadcast %cst_26 : f32 to vector<128x128xf32>
    %122 = arith.select %120, %118, %121 : vector<128x128xi1>, vector<128x128xf32>
    %123 = arith.maximumf %115, %122 : vector<128x128xf32>
    %c96_i32 = arith.constant 96 : i32
    %124 = vector.broadcast %c96_i32 : i32 to vector<1x128xi32>
    %125 = arith.cmpi slt, %0, %124 : vector<1x128xi32>
    %c96_i32_27 = arith.constant 96 : i32
    %126 = tpu.dynamic_rotate %123 by %c96_i32_27 dim 1 : vector<128x128xf32>, i32 -> vector<128x128xf32>
    %cst_28 = arith.constant -3.40282347E+38 : f32
    %127 = vector.shape_cast %125 : vector<1x128xi1> to vector<1x128xi1>
    %128 = vector.broadcast %127 : vector<1x128xi1> to vector<128x128xi1>
    %129 = vector.broadcast %cst_28 : f32 to vector<128x128xf32>
    %130 = arith.select %128, %126, %129 : vector<128x128xi1>, vector<128x128xf32>
    %131 = arith.maximumf %123, %130 : vector<128x128xf32>
    %c64_i32 = arith.constant 64 : i32
    %132 = vector.broadcast %c64_i32 : i32 to vector<1x128xi32>
    %133 = arith.cmpi slt, %0, %132 : vector<1x128xi32>
    %c64_i32_29 = arith.constant 64 : i32
    %134 = tpu.dynamic_rotate %131 by %c64_i32_29 dim 1 : vector<128x128xf32>, i32 -> vector<128x128xf32>
    %cst_30 = arith.constant -3.40282347E+38 : f32
    %135 = vector.shape_cast %133 : vector<1x128xi1> to vector<1x128xi1>
    %136 = vector.broadcast %135 : vector<1x128xi1> to vector<128x128xi1>
    %137 = vector.broadcast %cst_30 : f32 to vector<128x128xf32>
    %138 = arith.select %136, %134, %137 : vector<128x128xi1>, vector<128x128xf32>
    %139 = arith.maximumf %131, %138 : vector<128x128xf32>
    %140 = vector.broadcast %1 : vector<128x1xi32> to vector<128x128xi32>
    %141 = vector.broadcast %0 : vector<1x128xi32> to vector<128x128xi32>
    %142 = arith.cmpi sle, %140, %141 : vector<128x128xi32>
    %cst_31 = arith.constant 3.40282347E+38 : f32
    %143 = vector.broadcast %cst_31 : f32 to vector<128x128xf32>
    %144 = arith.select %142, %139, %143 : vector<128x128xi1>, vector<128x128xf32>
    %cst_32 = arith.constant dense<0x7F800000> : vector<128xf32>
    %145 = vector.multi_reduction <minimumf>, %144, %cst_32 [0] : vector<128x128xf32> to vector<128xf32>
    %146 = vector.shape_cast %145 : vector<128xf32> to vector<1x128xf32>
    %cst_33 = arith.constant 8.000000e+00 : f32
    %147 = vector.broadcast %cst_33 : f32 to vector<1x128xf32>
    %148 = arith.subf %147, %2 : vector<1x128xf32>
    %cst_34 = arith.constant 1.000000e+01 : f32
    %149 = vector.broadcast %cst_34 : f32 to vector<1x128xf32>
    %150 = arith.mulf %148, %149 : vector<1x128xf32>
    %151 = arith.subf %146, %150 : vector<1x128xf32>
    %cst_35 = arith.constant 1.000000e+00 : f32
    %152 = vector.broadcast %cst_35 : f32 to vector<1x128xf32>
    %153 = arith.addf %2, %152 : vector<1x128xf32>
    %cst_36 = arith.constant 1.250000e-01 : f32
    %154 = vector.broadcast %cst_36 : f32 to vector<1x128xf32>
    %155 = arith.mulf %153, %154 : vector<1x128xf32>
    %156 = arith.subf %155, %151 : vector<1x128xf32>
    %157 = math.absf %156 : vector<1x128xf32>
    %cst_37 = arith.constant 0.000000e+00 : f32
    %158 = vector.broadcast %cst_37 : f32 to vector<1x128xf32>
    %159 = arith.select %5, %157, %158 : vector<1x128xi1>, vector<1x128xf32>
    %160 = vector.shape_cast %159 : vector<1x128xf32> to vector<1x1x128xf32>
    %cst_38 = arith.constant dense<0xFF800000> : vector<1xf32>
    %161 = vector.multi_reduction <maximumf>, %160, %cst_38 [1, 2] : vector<1x1x128xf32> to vector<1xf32>
    %162 = vector.shape_cast %161 : vector<1xf32> to vector<1x1x1xf32>
    %163 = vector.extract %162[0, 0, 0] : f32 from vector<1x1x1xf32>
    %c0_39 = arith.constant 0 : index
    %c0_40 = arith.constant 0 : index
    %164 = memref.load %arg2[%c0_39, %c0_40] : memref<1x1xf32, #tpu.memory_space<smem>>
    memref.store %163, %arg2[%c0_39, %c0_40] : memref<1x1xf32, #tpu.memory_space<smem>>
    return
  }
}

</mosaic_0001>

<bundles_post_ra>
// kernel: tpu_custom_call.1
= control target key start
LH: loop header
LB: loop body
LE: loop exit
PB: predicated region body
PF: predicated region fallthrough
CT: control target
= control target key end

     0   :  { %v1568_v3 = vmov 0   ;;  %s2920_s0 = inlined_call_operand.vmem [shape: f32[1,128], index: 0, kind: input, shape index: {}]   ;;  %s2921_s1 = inlined_call_operand.vmem [shape: f32[128,1], index: 1, kind: input, shape index: {}]   ;;  %s2922_s2 = inlined_call_operand.hbm [shape: f32[1,1], index: 2, kind: output, shape index: {}]  }
   0x1   :  { %v67_v0 = vld [vmem:[%s2921_s1] sm:$0xff]  ;;  %v68_v1 = vld [vmem:[%s2921_s1 + $0x8] sm:$0xff]  ;;  %v69_v2 = vld [vmem:[%s2921_s1 + $0x10] sm:$0xff]  ;;  %1522 = vset.pattern.permute.xlu0 %v1568_v3  ;;  %1523 = vset.pattern.permute.xlu1 %v1568_v3 }
   0x2   :  { %v83_v4 = vsub.f32 0.0, %v67_v0  ;;  %v84_v5 = vsub.f32 0.0, %v68_v1  ;;  %v85_v6 = vsub.f32 0.0, %v69_v2  ;;  %v70_v7 = vld [vmem:[%s2921_s1 + $0x18] sm:$0xff] }
   0x4   :  { %107 = vperm.xlu0 %1522, %v83_v4   ;;  %112 = vperm.xlu1 %1523, %v84_v5  }
   0x5   :  { %7 = vsyncpa [#allocation3], 0  ;;  %v86_v8 = vsub.f32 0.0, %v70_v7  ;;  %v71_v9 = vld [vmem:[%s2921_s1 + $0x20] sm:$0xff]  ;;  %v72_v11 = vld [vmem:[%s2921_s1 + $0x28] sm:$0xff]  ;;  %v12_v21 = vlaneseq  ;;  %v1569_v61 = vmov 0.0  }
   0x6   :  { %v87_v10 = vsub.f32 0.0, %v71_v9  ;;  %v88_v12 = vsub.f32 0.0, %v72_v11  ;;  %v74_v13 = vld [vmem:[%s2921_s1 + $0x38] sm:$0xff]  ;;  %v75_v15 = vld [vmem:[%s2921_s1 + $0x40] sm:$0xff]  ;;  %v76_v17 = vld [vmem:[%s2921_s1 + $0x48] sm:$0xff]  ;;  %s1571_s14 = smov 126  }
   0x7   :  { %v90_v14 = vsub.f32 0.0, %v74_v13  ;;  %v91_v16 = vsub.f32 0.0, %v75_v15  ;;  %v92_v18 = vsub.f32 0.0, %v76_v17  ;;  %v77_v19 = vld [vmem:[%s2921_s1 + $0x50] sm:$0xff]  ;;  %v1623_v22 = vshrl.u32 %v12_v21, 7  ;;  %v78_v34 = vld [vmem:[%s2921_s1 + $0x58] sm:$0xff] }
   0x8   :  { %117 = vperm.xlu1 %1523, %v85_v6   ;;  %v93_v20 = vsub.f32 0.0, %v77_v19  ;;  %v65_v23 = vld [vmem:[%s2920_s0] sm:$0x1]  ;;  %v1629_v26 = vand.u32 127, %v12_v21  ;;  %v94_v35 = vsub.f32 0.0, %v78_v34  ;;  %v80_v36 = vld [vmem:[%s2921_s1 + $0x68] sm:$0xff] }
   0x9   :  { %v66_v24 = vsub.f32 0.0, %v65_v23  ;;  %v102_v25 = vsub.s32 0, %v1623_v22  ;;  %v73_v37 = vld [vmem:[%s2921_s1 + $0x30] sm:$0xff]  ;;  %v96_v38 = vsub.f32 0.0, %v80_v36  ;;  %v82_v40 = vld [vmem:[%s2921_s1 + $0x78] sm:$0xff]  ;;  %v79_v41 = vld [vmem:[%s2921_s1 + $0x60] sm:$0xff] }
   0xa   :  { %vm217_vm0 = vcmp.lt.s32.totalorder %v1629_v26, %v1623_v22  ;;  %vm2936_vm3 = vcmp.lt.s32.totalorder %v1629_v26, 8  ;;  %v89_v39 = vsub.f32 0.0, %v73_v37  ;;  %v98_v42 = vsub.f32 0.0, %v82_v40  ;;  %v81_v44 = vld [vmem:[%s2921_s1 + $0x70] sm:$0xff]  ;;  %s1570_s1 = smov 127   ;;  %s1572_s15 = smov 124  }
   0xb   :  { %v103_v27 = vrot.slane %v66_v24, %v102_v25  ;;  %v95_v43 = vsub.f32 0.0, %v79_v41  ;;  %v97_v45 = vsub.f32 0.0, %v81_v44  ;;  %v1661_v44 = vadd.s32 32, %v1623_v22  ;;  %s1573_s16 = smov 120   ;;  %s1574_s17 = smov 112  }
   0xc   :  { %122 = vperm.xlu1 %1523, %v86_v8   ;;  %s1575_s18 = smov 96   ;;  %s1576_s19 = smov 64  }
   0xd   :  { %s1556_s23 = scalar_lea.hbm %s2922_s2, 16 }
   0xe   :  { %p1557_p0 = scmp.ne.s32.totalorder %s2922_s2, %s1556_s23  ;;  %p1560_p1 = scmp.lt.u32.totalorder %s1556_s23, %s2922_s2 }
  0x10   :  { %127 = vperm.xlu1 %1523, %v87_v10   ;;  %p1562_p2 = pnand %p1560_p1, %p1557_p0 }
  0x14   :  { %132 = vperm.xlu1 %1523, %v88_v12  }
  0x18   :  { %142 = vperm.xlu1 %1523, %v90_v14  }
  0x1c   :  { %147 = vperm.xlu1 %1523, %v91_v16  }
  0x20   :  { %152 = vperm.xlu1 %1523, %v92_v18  }
  0x24   :  { %157 = vperm.xlu1 %1523, %v93_v20  }
  0x83   :  { %v108_v28 = vpop.permute.xlu0 %107  ;;  %v113_v46 = vpop.permute.xlu1 %112 }
  0x84   :  { %vm185_vm1 = vcmp.gt.f32.partialorder %v103_v27, %v108_v28  ;;  %vm201_vm2 = vcmp.eq.f32.partialorder %v103_v27, %v108_v28  ;;  %v588_v63 = vmul.f32 0.0, %v113_v46 }
  0x85   :  { %vm233_vm4 = vmand %vm201_vm2, %vm217_vm0 }
  0x86   :  { %vm249_vm5 = vmor %vm185_vm1, %vm233_vm4 }
  0x87   :  { %vm267_vm6 = vmand %vm249_vm5, %vm2936_vm3  ;;  %v118_v47 = vpop.permute.xlu1 %117 }
  0x88   :  { %v283_v29 = vsel %vm267_vm6, 1, %v1568_v3  ;;  %v589_v1 = vmul.f32 0.0, %v118_v47 }
  0x89   :  { %v300_v30 = vshrl.u32 %v283_v29, 16  ;;  %v299_v31 = vand.u32 65535, %v283_v29 }
  0x8b   :  { %v302_v32 = vcvt.s32.f32 %v300_v30  ;;  %v301_v33 = vcvt.s32.f32 %v299_v31  ;;  %v123_v48 = vpop.permute.xlu1 %122 }
  0x8c   :  { %v590_v3 = vmul.f32 0.0, %v123_v48  ;;  %v1667_v48 = vadd.s32 48, %v1623_v22 }
  0x8d   :  { %305 = vadd.xlane.f32.xlu0 %v302_v32  ;;  %303 = vadd.xlane.f32.xlu1 %v301_v33 }
  0x8f   :  { %v128_v49 = vpop.permute.xlu1 %127 }
  0x90   :  { %v591_v5 = vmul.f32 0.0, %v128_v49  ;;  %v1670_v49 = vadd.s32 24, %v1623_v22 }
  0x93   :  { %v133_v50 = vpop.permute.xlu1 %132 }
  0x94   :  { %v592_v8 = vmul.f32 0.0, %v133_v50  ;;  %v1498_v50 = vadd.s32 4294967295, %v1661_v44 }
  0x96   :  { %vm644_vm10 = vcmp.eq.s32.totalorder %v1629_v26, %v1498_v50 }
  0x97   :  { %v143_v51 = vpop.permute.xlu1 %142 }
  0x98   :  { %v594_v12 = vmul.f32 0.0, %v143_v51 }
  0x9b   :  { %v148_v52 = vpop.permute.xlu1 %147 }
  0x9c   :  { %v595_v15 = vmul.f32 0.0, %v148_v52 }
  0x9e   :  { %162 = vperm.xlu1 %1523, %v94_v35  }
  0x9f   :  { %v153_v53 = vpop.permute.xlu1 %152 }
  0xa0   :  { %v596_v17 = vmul.f32 0.0, %v153_v53 }
  0xa2   :  { %172 = vperm.xlu1 %1523, %v96_v38  }
  0xa3   :  { %137 = vperm.xlu0 %1522, %v89_v39   ;;  %v158_v54 = vpop.permute.xlu1 %157  ;;  %v1656_v39 = vadd.s32 8, %v1623_v22 }
  0xa4   :  { %v597_v20 = vmul.f32 0.0, %v158_v54 }
  0xa6   :  { %182 = vperm.xlu1 %1523, %v98_v42   ;;  %v1495_v42 = vadd.s32 4294967295, %v1656_v39 }
  0xa7   :  { %167 = vperm.xlu0 %1522, %v95_v43   ;;  %v1494_v43 = vadd.s32 4294967295, %v1623_v22 }
  0xa8   :  { %vm641_vm8 = vcmp.eq.s32.totalorder %v1629_v26, %v1495_v42  ;;  %v35_v42 = vcvt.s32.f32 %v1670_v49 }
  0xa9   :  { %vm640_vm9 = vcmp.eq.s32.totalorder %v1629_v26, %v1494_v43 }
  0xab   :  { %177 = vperm.xlu0 %1522, %v97_v45   ;;  %v1664_v45 = vadd.s32 16, %v1623_v22 }
  0xad   :  { %v1496_v51 = vadd.s32 4294967295, %v1664_v45 }
  0xaf   :  { %vm642_vm11 = vcmp.eq.s32.totalorder %v1629_v26, %v1496_v51 }
 0x11a   :  { %v306_v55 = vpop.xlane.xlu0 %305  ;;  %v304_v56 = vpop.xlane.xlu1 %303 }
 0x11b   :  { %v308_v57 = vcvt.f32.s32 %v306_v55  ;;  %v307_v59 = vcvt.f32.s32 %v304_v56  ;;  %v1681_v55 = vadd.s32 64, %v1623_v22  ;;  %v1684_v56 = vadd.s32 40, %v1623_v22 }
 0x11d   :  { %v309_v58 = vshll.u32 %v308_v57, 16  ;;  %v1500_v57 = vadd.s32 4294967295, %v1667_v48  ;;  %v40_v43 = vcvt.s32.f32 %v1681_v55  ;;  %v37_v50 = vcvt.s32.f32 %v1684_v56 }
 0x11e   :  { %v163_v14 = vpop.permute.xlu1 %162 }
 0x11f   :  { %v310_v60 = vadd.s32 %v309_v58, %v307_v59  ;;  %v598_v24 = vmul.f32 0.0, %v163_v14  ;;  %v1497_v58 = vadd.s32 4294967295, %v1670_v49  ;;  %vm646_vm12 = vcmp.eq.s32.totalorder %v1629_v26, %v1500_v57 }
 0x121   :  { %vm491_vm7 = vcmp.le.s32.totalorder %v310_v60, %v1629_v26  ;;  %vm643_vm13 = vcmp.eq.s32.totalorder %v1629_v26, %v1497_v58 }
 0x122   :  { %v1493_v62 = vsel %vm491_vm7, 1.0, %v1569_v61  ;;  %v138_v7 = vpop.permute.xlu0 %137  ;;  %v173_v23 = vpop.permute.xlu1 %172  ;;  %v1502_v61 = vadd.s32 4294967295, %v1681_v55 }
 0x123   :  { %v587_v0 = vmul.f32 %v1493_v62, %v108_v28  ;;  %v593_v10 = vmul.f32 0.0, %v138_v7  ;;  %v600_v30 = vmul.f32 0.0, %v173_v23  ;;  %v1694_v62 = vadd.s32 80, %v1623_v22 }
 0x124   :  { %vm648_vm14 = vcmp.eq.s32.totalorder %v1629_v26, %v1502_v61 }
 0x125   :  { %v603_v2 = vadd.f32 %v588_v63, %v587_v0  ;;  %v1499_v63 = vadd.s32 4294967295, %v1684_v56  ;;  %v1700_v0 = vadd.s32 56, %v1623_v22  ;;  %v2925_v61 = vcvt.s32.f32 %v1694_v62 }
 0x126   :  { %v168_v19 = vpop.permute.xlu0 %167  ;;  %v183_v32 = vpop.permute.xlu1 %182 }
 0x127   :  { %v604_v4 = vadd.f32 %v603_v2, %v589_v1  ;;  %v599_v27 = vmul.f32 0.0, %v168_v19  ;;  %v602_v35 = vmul.f32 0.0, %v183_v32  ;;  %vm645_vm15 = vcmp.eq.s32.totalorder %v1629_v26, %v1499_v63 }
 0x128   :  { %v36_v32 = vcvt.s32.f32 %v1661_v44 }
 0x129   :  { %v605_v6 = vadd.f32 %v604_v4, %v590_v3  ;;  %v1504_v3 = vadd.s32 4294967295, %v1694_v62  ;;  %v1501_v4 = vadd.s32 4294967295, %v1700_v0 }
 0x12a   :  { %v178_v29 = vpop.permute.xlu0 %177 }
 0x12b   :  { %v606_v9 = vadd.f32 %v605_v6, %v591_v5  ;;  %v601_v33 = vmul.f32 0.0, %v178_v29  ;;  %v1709_v5 = vadd.s32 96, %v1623_v22  ;;  %v1712_v6 = vadd.s32 72, %v1623_v22 }
 0x12c   :  { %vm650_vm0 = vcmp.eq.s32.totalorder %v1629_v26, %v1504_v3  ;;  %vm647_vm1 = vcmp.eq.s32.totalorder %v1629_v26, %v1501_v4  ;;  %v33_v29 = vcvt.s32.f32 %v1656_v39  ;;  %v2924_v3 = vcvt.s32.f32 %v1700_v0 }
 0x12d   :  { %v607_v11 = vadd.f32 %v606_v9, %v592_v8  ;;  %v1717_v9 = vadd.s32 112, %v1623_v22 }
 0x12f   :  { %v608_v13 = vadd.f32 %v607_v11, %v593_v10  ;;  %v1720_v10 = vadd.s32 88, %v1623_v22  ;;  %v1506_v11 = vadd.s32 4294967295, %v1709_v5 }
 0x131   :  { %v609_v16 = vadd.f32 %v608_v13, %v594_v12  ;;  %v1503_v12 = vadd.s32 4294967295, %v1712_v6  ;;  %vm652_vm2 = vcmp.eq.s32.totalorder %v1629_v26, %v1506_v11 }
 0x133   :  { %v610_v18 = vadd.f32 %v609_v16, %v595_v15  ;;  %v1729_v15 = vadd.s32 104, %v1623_v22  ;;  %vm649_vm4 = vcmp.eq.s32.totalorder %v1629_v26, %v1503_v12  ;;  %v1508_v16 = vadd.s32 4294967295, %v1717_v9 }
 0x135   :  { %v611_v21 = vadd.f32 %v610_v18, %v596_v17  ;;  %v1505_v17 = vadd.s32 4294967295, %v1720_v10  ;;  %vm654_vm5 = vcmp.eq.s32.totalorder %v1629_v26, %v1508_v16  ;;  %v817_v16 = vmul.f32 0.5, %v33_v29 }
 0x137   :  { %v612_v25 = vadd.f32 %v611_v21, %v597_v20  ;;  %vm651_vm6 = vcmp.eq.s32.totalorder %v1629_v26, %v1505_v17  ;;  %v1507_v20 = vadd.s32 4294967295, %v1729_v15  ;;  %v1741_v21 = vadd.s32 120, %v1623_v22 }
 0x139   :  { %v613_v28 = vadd.f32 %v612_v25, %v598_v24  ;;  %vm653_vm7 = vcmp.eq.s32.totalorder %v1629_v26, %v1507_v20  ;;  %v1509_v25 = vadd.s32 4294967295, %v1741_v21 }
 0x13b   :  { %v614_v31 = vadd.f32 %v613_v28, %v599_v27 }
 0x13d   :  { %v615_v34 = vadd.f32 %v614_v31, %v600_v30  ;;  %v1752_v30 = vcvt.s32.f32 %v1629_v26  ;;  %v32_v31 = vcvt.s32.f32 %v1623_v22 }
 0x13f   :  { %v616_v36 = vadd.f32 %v615_v34, %v601_v33  ;;  %v705_v33 = vsub.f32 %v1752_v30, %v33_v29  ;;  %v34_v34 = vcvt.s32.f32 %v1664_v45  ;;  %v707_v57 = vsub.f32 %v1752_v30, %v35_v42 }
 0x140   :  { %v709_v63 = vsub.f32 %v1752_v30, %v37_v50  ;;  %v714_v11 = vsub.f32 %v1752_v30, %v2925_v61  ;;  %v2923_v29 = vcvt.s32.f32 %v1709_v5 }
 0x141   :  { %v617_v37 = vadd.f32 %v616_v36, %v602_v35  ;;  %v704_v35 = vsub.f32 %v1752_v30, %v32_v31  ;;  %v38_v36 = vcvt.s32.f32 %v1667_v48 }
 0x143   :  { %v618_v38 = vrot.slane %v617_v37, 4 }
 0x145   :  { %v619_v40 = vadd.f32 %v618_v38, %v617_v37  ;;  %v708_v37 = vsub.f32 %v1752_v30, %v36_v32  ;;  %v721_v38 = vadd.f32 1.0, %v705_v33 }
 0x147   :  { %v620_v41 = vrot.slane %v619_v40, 2  ;;  %v737_v51 = vmax.f32 %v721_v38, 1.0 }
 0x149   :  { %v621_v46 = vadd.f32 %v620_v41, %v619_v40  ;;  %v720_v40 = vadd.f32 1.0, %v704_v35  ;;  %v706_v41 = vsub.f32 %v1752_v30, %v34_v34  ;;  %1524 = vrcp.f32 %v737_v51 }
 0x14b   :  { %v622_v47 = vrot.slane %v621_v46, 1 }
 0x14d   :  { %v1676_v52 = vadd.f32 %v622_v47, %v621_v46  ;;  %v724_v46 = vadd.f32 1.0, %v708_v37  ;;  %v710_v47 = vsub.f32 %v1752_v30, %v38_v36  ;;  %v820_v37 = vmul.f32 0.5, %v36_v32 }
 0x14f   :  { %v657_v53 = vsel %vm641_vm8, %v1676_v52, 0.0  ;;  %v656_v54 = vsel %vm640_vm9, %v1676_v52, 0.0  ;;  %v660_v59 = vsel %vm644_vm10, %v1676_v52, 0.0  ;;  %v658_v60 = vsel %vm642_vm11, %v1676_v52, 0.0 }
 0x150   :  { %674 = vadd.xlane.f32.xlu1 %v657_v53  ;;  %672 = vadd.xlane.f32.xlu0 %v656_v54  ;;  %v662_v1 = vsel %vm646_vm12, %v1676_v52, 0.0  ;;  %v659_v2 = vsel %vm643_vm13, %v1676_v52, 0.0  ;;  %v664_v7 = vsel %vm648_vm14, %v1676_v52, 0.0  ;;  %v661_v8 = vsel %vm645_vm15, %v1676_v52, 0.0 }
 0x151   :  { %v666_v13 = vsel %vm650_vm0, %v1676_v52, 0.0  ;;  %v663_v14 = vsel %vm647_vm1, %v1676_v52, 0.0  ;;  %v668_v18 = vsel %vm652_vm2, %v1676_v52, 0.0  ;;  %v665_v19 = vsel %vm649_vm4, %v1676_v52, 0.0 }
 0x152   :  { %v670_v23 = vsel %vm654_vm5, %v1676_v52, 0.0  ;;  %v667_v24 = vsel %vm651_vm6, %v1676_v52, 0.0  ;;  %v669_v27 = vsel %vm653_vm7, %v1676_v52, 0.0  ;;  %vm655_vm8 = vcmp.eq.s32.totalorder %v1629_v26, %v1509_v25 }
 0x153   :  { %v671_v28 = vsel %vm655_vm8, %v1676_v52, 0.0  ;;  %v736_v53 = vmax.f32 %v720_v40, 1.0  ;;  %v722_v54 = vadd.f32 1.0, %v706_v41  ;;  %v740_v58 = vmax.f32 %v724_v46, 1.0  ;;  %v1525_v20 = vpop.eup %1524 }
 0x154   :  { %680 = vadd.xlane.f32.xlu1 %v660_v59  ;;  %676 = vadd.xlane.f32.xlu0 %v658_v60  ;;  %v726_v59 = vadd.f32 1.0, %v710_v47  ;;  %v712_v60 = vsub.f32 %v1752_v30, %v40_v43  ;;  %v833_v25 = vsub.f32 8.0, %v817_v16  ;;  %v769_v33 = vmul.f32 %v1525_v20, %v737_v51 }
 0x155   :  { %1526 = vrcp.f32 %v736_v53  ;;  %v2926_v41 = vcvt.s32.f32 %v1712_v6  ;;  %v2929_v46 = vcvt.s32.f32 %v1717_v9  ;;  %vm945_vm9 = vcmp.lt.s32.totalorder %v1629_v26, 127 }
 0x156   :  { %1528 = vrcp.f32 %v740_v58  ;;  %v742_v4 = vmax.f32 %v726_v59, 1.0  ;;  %v1806_v59 = vmul.f32 -5.0, %v1752_v30  ;;  %vm1012_vm10 = vcmp.lt.s32.totalorder %v1629_v26, 126 }
 0x157   :  { %v713_v16 = vsub.f32 %v1752_v30, %v2926_v41  ;;  %vm1079_vm11 = vcmp.lt.s32.totalorder %v1629_v26, 124  ;;  %vm1146_vm12 = vcmp.lt.s32.totalorder %v1629_v26, 120  ;;  %vm1213_vm13 = vcmp.lt.s32.totalorder %v1629_v26, 112 }
 0x158   :  { %684 = vadd.xlane.f32.xlu1 %v662_v1  ;;  %678 = vadd.xlane.f32.xlu0 %v659_v2  ;;  %v738_v1 = vmax.f32 %v722_v54, 1.0  ;;  %v1778_v2 = vadd.f32 1.0, %v707_v57  ;;  %v849_v57 = vmul.f32 10.0, %v833_v25  ;;  %vm1280_vm14 = vcmp.lt.s32.totalorder %v1629_v26, 96 }
 0x159   :  { %vm1347_vm15 = vcmp.lt.s32.totalorder %v1629_v26, 64  ;;  %vm1414_vm0 = vcmp.le.s32.totalorder %v1623_v22, %v1629_v26  ;;  %vm1415_vm1 = vcmp.le.s32.totalorder %v1656_v39, %v1629_v26  ;;  %vm1418_vm2 = vcmp.le.s32.totalorder %v1661_v44, %v1629_v26 }
 0x15a   :  { %1530 = vrcp.f32 %v738_v1  ;;  %v739_v12 = vmax.f32 %v1778_v2, 1.0  ;;  %vm1420_vm4 = vcmp.le.s32.totalorder %v1667_v48, %v1629_v26  ;;  %vm1416_vm5 = vcmp.le.s32.totalorder %v1664_v45, %v1629_v26 }
 0x15b   :  { %1532 = vrcp.f32 %v742_v4  ;;  %vm1417_vm6 = vcmp.le.s32.totalorder %v1670_v49, %v1629_v26  ;;  %vm1419_vm7 = vcmp.le.s32.totalorder %v1684_v56, %v1629_v26  ;;  %vm1422_vm8 = vcmp.le.s32.totalorder %v1681_v55, %v1629_v26 }
 0x15c   :  { %688 = vadd.xlane.f32.xlu1 %v664_v7  ;;  %682 = vadd.xlane.f32.xlu0 %v661_v8  ;;  %v1781_v7 = vadd.f32 1.0, %v712_v60  ;;  %v1783_v8 = vadd.f32 1.0, %v709_v63  ;;  %1534 = vrcp.f32 %v739_v12  ;;  %v785_v60 = vsub.f32 2.0, %v769_v33 }
 0x15d   :  { %v2928_v63 = vcvt.s32.f32 %v1720_v10 }
 0x15e   :  { %v741_v17 = vmax.f32 %v1783_v8, 1.0 }
 0x160   :  { %692 = vadd.xlane.f32.xlu1 %v666_v13  ;;  %686 = vadd.xlane.f32.xlu0 %v663_v14  ;;  %v744_v13 = vmax.f32 %v1781_v7, 1.0  ;;  %v711_v14 = vsub.f32 %v1752_v30, %v2924_v3 }
 0x162   :  { %1536 = vrcp.f32 %v744_v13 }
 0x163   :  { %1538 = vrcp.f32 %v741_v17 }
 0x164   :  { %696 = vadd.xlane.f32.xlu1 %v668_v18  ;;  %690 = vadd.xlane.f32.xlu0 %v665_v19  ;;  %v1794_v18 = vadd.f32 1.0, %v714_v11  ;;  %v816_v19 = vmul.f32 0.5, %v32_v31  ;;  %v818_v31 = vmul.f32 0.5, %v34_v34  ;;  %v716_v34 = vsub.f32 %v1752_v30, %v2923_v29 }
 0x165   :  { %v2930_v11 = vcvt.s32.f32 %v1729_v15 }
 0x166   :  { %v832_v35 = vsub.f32 8.0, %v816_v19  ;;  %v1831_v3 = vadd.f32 1.0, %v716_v34 }
 0x167   :  { %v717_v7 = vsub.f32 %v1752_v30, %v2930_v11 }
 0x168   :  { %700 = vadd.xlane.f32.xlu1 %v670_v23  ;;  %694 = vadd.xlane.f32.xlu0 %v667_v24  ;;  %v1527_v23 = vpop.eup %1526  ;;  %v1798_v24 = vadd.f32 1.0, %v711_v14  ;;  %v848_v32 = vmul.f32 10.0, %v832_v35  ;;  %v1822_v35 = vadd.f32 %v1806_v59, %v849_v57  ;;  %v718_v57 = vsub.f32 %v1752_v30, %v2929_v46 }
 0x169   :  { %v768_v38 = vmul.f32 %v1527_v23, %v736_v53  ;;  %v836_v53 = vsub.f32 8.0, %v820_v37  ;;  %v1875_v11 = vadd.f32 1.0, %v717_v7 }
 0x16a   :  { %v2927_v47 = vmax.f32 %v1798_v24, 1.0 }
 0x16b   :  { %v784_v2 = vsub.f32 2.0, %v768_v38  ;;  %v1826_v38 = vmul.f32 %v1525_v20, %v785_v60  ;;  %v852_v29 = vmul.f32 10.0, %v836_v53  ;;  %v1840_v20 = vadd.f32 1.0, %v713_v16 }
 0x16c   :  { %698 = vadd.xlane.f32.xlu0 %v669_v27  ;;  %v746_v27 = vmax.f32 %v1794_v18, 1.0  ;;  %v715_v60 = vsub.f32 %v1752_v30, %v2928_v63 }
 0x16d   :  { %v1833_v41 = vmul.f32 %v1527_v23, %v784_v2 }
 0x16e   :  { %1540 = vrcp.f32 %v746_v27 }
 0x16f   :  { %1542 = vrcp.f32 %v2927_v47 }
 0x170   :  { %702 = vadd.xlane.f32.xlu0 %v671_v28  ;;  %v1529_v28 = vpop.eup %1528 }
 0x171   :  { %v1531_v40 = vpop.eup %1530  ;;  %v772_v54 = vmul.f32 %v1529_v28, %v740_v58  ;;  %v834_v58 = vsub.f32 8.0, %v818_v31  ;;  %v1829_v31 = vadd.f32 %v1806_v59, %v848_v32 }
 0x172   :  { %v1533_v51 = vpop.eup %1532  ;;  %v770_v8 = vmul.f32 %v1531_v40, %v738_v1  ;;  %v822_v1 = vmul.f32 0.5, %v38_v36  ;;  %v819_v36 = vmul.f32 0.5, %v35_v42  ;;  %v824_v42 = vmul.f32 0.5, %v40_v43 }
 0x173   :  { %v1535_v19 = vpop.eup %1534  ;;  %v788_v25 = vsub.f32 2.0, %v772_v54  ;;  %v774_v33 = vmul.f32 %v1533_v51, %v742_v4  ;;  %v850_v4 = vmul.f32 10.0, %v834_v58 }
 0x174   :  { %v1537_v37 = vpop.eup %1536  ;;  %v786_v54 = vsub.f32 2.0, %v770_v8  ;;  %v771_v47 = vmul.f32 %v1535_v19, %v739_v12  ;;  %v838_v34 = vsub.f32 8.0, %v822_v1  ;;  %v1850_v8 = vadd.f32 %v1806_v59, %v852_v29 }
 0x175   :  { %v1539_v61 = vpop.eup %1538  ;;  %v1845_v32 = vmul.f32 %v1529_v28, %v788_v25  ;;  %v790_v23 = vsub.f32 2.0, %v774_v33  ;;  %v776_v53 = vmul.f32 %v1537_v37, %v744_v13  ;;  %v2932_v12 = vmax.f32 %v1831_v3, 1.0 }
 0x176   :  { %v773_v2 = vmul.f32 %v1539_v61, %v741_v17  ;;  %v1856_v16 = vadd.f32 %v1806_v59, %v850_v4  ;;  %v821_v28 = vmul.f32 0.5, %v37_v50  ;;  %v1860_v25 = vadd.f32 1.0, %v718_v57 }
 0x177   :  { %v787_v13 = vsub.f32 2.0, %v771_v47  ;;  %v835_v17 = vsub.f32 8.0, %v819_v36  ;;  %v2931_v29 = vmax.f32 %v1840_v20, 1.0  ;;  %v1866_v33 = vadd.f32 1.0, %v715_v60 }
 0x178   :  { %v1541_v58 = vpop.eup %1540  ;;  %v802_v43 = vmul.f32 %v1531_v40, %v786_v54  ;;  %v1868_v1 = vmul.f32 %v1533_v51, %v790_v23  ;;  %v792_v4 = vsub.f32 2.0, %v776_v53  ;;  %v854_v63 = vmul.f32 10.0, %v838_v34 }
 0x179   :  { %v1543_v46 = vpop.eup %1542  ;;  %v789_v14 = vsub.f32 2.0, %v773_v2  ;;  %v778_v50 = vmul.f32 %v1541_v58, %v746_v27  ;;  %1544 = vrcp.f32 %v2932_v12  ;;  %v840_v57 = vsub.f32 8.0, %v824_v42 }
 0x17a   :  { %v837_v47 = vsub.f32 8.0, %v821_v28  ;;  %v2933_v36 = vmax.f32 %v1860_v25, 1.0  ;;  %v2937_v40 = vcvt.s32.f32 %v1741_v21  ;;  %v1880_v54 = vmul.f32 %v1535_v19, %v787_v13 }
 0x17b   :  { %v851_v60 = vmul.f32 10.0, %v835_v17  ;;  %1546 = vrcp.f32 %v2931_v29  ;;  %v2935_v18 = vmax.f32 %v1866_v33, 1.0  ;;  %v2938_v27 = vmax.f32 %v1798_v24, 1.0 }
 0x17c   :  { %v719_v51 = vsub.f32 %v1752_v30, %v2937_v40  ;;  %v1888_v53 = vadd.f32 %v1806_v59, %v854_v63  ;;  %v2939_v34 = vcvt.s32.f32 %v1694_v62  ;;  %v2940_v42 = vcvt.s32.f32 %v1700_v0 }
 0x17d   :  { %v775_v23 = vmul.f32 %v1543_v46, %v2938_v27  ;;  %v1894_v19 = vmul.f32 %v1537_v37, %v792_v4  ;;  %v1896_v7 = vmul.f32 %v1539_v61, %v789_v14  ;;  %v794_v13 = vsub.f32 2.0, %v778_v50 }
 0x17e   :  { %v826_v2 = vmul.f32 0.5, %v2939_v34  ;;  %v823_v28 = vmul.f32 0.5, %v2940_v42  ;;  %v856_v17 = vmul.f32 10.0, %v840_v57  ;;  %v853_v12 = vmul.f32 10.0, %v837_v47 }
 0x17f   :  { %1548 = vrcp.f32 %v2933_v36  ;;  %v2934_v24 = vmax.f32 %v1875_v11, 1.0  ;;  %v1901_v63 = vadd.f32 1.0, %v719_v51  ;;  %v1906_v37 = vadd.f32 %v1806_v59, %v851_v60 }
 0x180   :  { %1550 = vrcp.f32 %v2935_v18  ;;  %v791_v61 = vsub.f32 2.0, %v775_v23  ;;  %v842_v14 = vsub.f32 8.0, %v826_v2  ;;  %v839_v4 = vsub.f32 8.0, %v823_v28 }
 0x181   :  { %v2941_v50 = vcvt.s32.f32 %v1709_v5  ;;  %v1914_v42 = vmul.f32 %v1541_v58, %v794_v13  ;;  %v1920_v36 = vadd.f32 %v1806_v59, %v853_v12  ;;  %1552 = vrcp.f32 %v2934_v24 }
 0x182   :  { %v2942_v23 = vcvt.s32.f32 %v1712_v6  ;;  %v858_v12 = vmul.f32 10.0, %v842_v14 }
 0x183   :  { %v828_v57 = vmul.f32 0.5, %v2941_v50  ;;  %v1545_v28 = vpop.eup %1544 }
 0x184   :  { %v825_v2 = vmul.f32 0.5, %v2942_v23 }
 0x185   :  { %v844_v50 = vsub.f32 8.0, %v828_v57  ;;  %v1547_v24 = vpop.eup %1546 }
 0x1dd   :  { %v675_v40 = vpop.xlane.xlu1 %674  ;;  %v673_v29 = vpop.xlane.xlu0 %672 }
 0x1de   :  { %v882_v27 = vsub.f32 %v1676_v52, %v675_v40  ;;  %v881_v34 = vsub.f32 %v1676_v52, %v673_v29  ;;  %v1917_v29 = vadd.f32 %v1806_v59, %v856_v17 }
 0x1e0   :  { %v898_v47 = vmul.f32 %v882_v27, %v1826_v38  ;;  %v897_v51 = vmul.f32 %v881_v34, %v1833_v41  ;;  %v1931_v27 = vmul.f32 %v1543_v46, %v791_v61  ;;  %v855_v34 = vmul.f32 10.0, %v839_v4 }
 0x1e1   :  { %v681_v60 = vpop.xlane.xlu1 %680  ;;  %v677_v40 = vpop.xlane.xlu0 %676  ;;  %v2943_v46 = vmax.f32 %v1831_v3, 1.0  ;;  %v2945_v61 = vcvt.s32.f32 %v1717_v9  ;;  %v2946_v3 = vmax.f32 %v1840_v20, 1.0 }
 0x1e2   :  { %v885_v41 = vsub.f32 %v1676_v52, %v681_v60  ;;  %v883_v58 = vsub.f32 %v1676_v52, %v677_v40  ;;  %v914_v13 = vsub.f32 %v1822_v35, %v898_v47  ;;  %v913_v17 = vsub.f32 %v1829_v31, %v897_v51 }
 0x1e3   :  { %v780_v31 = vmul.f32 %v1545_v28, %v2943_v46  ;;  %v830_v14 = vmul.f32 0.5, %v2945_v61 }
 0x1e4   :  { %v901_v18 = vmul.f32 %v885_v41, %v1845_v32  ;;  %v899_v23 = vmul.f32 %v883_v58, %v802_v43  ;;  %v1936_v38 = vsel %vm2936_vm3, %v914_v13, -3.4028235e+38  ;;  %v1940_v60 = vsel %vm2936_vm3, %v913_v17, -3.4028235e+38  ;;  %v1956_v41 = vpop.eup %1548 }
 0x1e5   :  { %v685_v35 = vpop.xlane.xlu1 %684  ;;  %v679_v47 = vpop.xlane.xlu0 %678  ;;  %948 = vrot.lane.b32.xlu0 %v1936_v38, %s1570_s1  ;;  %946 = vrot.lane.b32.xlu1 %v1940_v60, %s1570_s1  ;;  %v841_v32 = vsub.f32 8.0, %v825_v2  ;;  %v2944_v43 = vmax.f32 %v1901_v63, 1.0  ;;  %v777_v58 = vmul.f32 %v1547_v24, %v2946_v3  ;;  %v1961_v2 = vadd.f32 %v1806_v59, %v858_v12 }
 0x1e6   :  { %v887_v4 = vsub.f32 %v1676_v52, %v685_v35  ;;  %v884_v57 = vsub.f32 %v1676_v52, %v679_v47  ;;  %v917_v51 = vsub.f32 %v1850_v8, %v901_v18  ;;  %v915_v40 = vsub.f32 %v1856_v16, %v899_v23  ;;  %v1551_v46 = vpop.eup %1550 }
 0x1e7   :  { %1554 = vrcp.f32 %v2944_v43  ;;  %v1964_v13 = vadd.f32 %v1806_v59, %v855_v34  ;;  %v860_v17 = vmul.f32 10.0, %v844_v50  ;;  %v796_v12 = vsub.f32 2.0, %v780_v31 }
 0x1e8   :  { %v903_v35 = vmul.f32 %v887_v4, %v1868_v1  ;;  %v900_v47 = vmul.f32 %v884_v57, %v1880_v54  ;;  %v1970_v8 = vsel %vm2936_vm3, %v917_v51, -3.4028235e+38  ;;  %v1974_v20 = vsel %vm2936_vm3, %v915_v40, -3.4028235e+38  ;;  %v1553_v57 = vpop.eup %1552 }
 0x1e9   :  { %v689_v16 = vpop.xlane.xlu1 %688  ;;  %v683_v18 = vpop.xlane.xlu0 %682  ;;  %954 = vrot.lane.b32.xlu0 %v1970_v8, %s1570_s1  ;;  %950 = vrot.lane.b32.xlu1 %v1974_v20, %s1570_s1  ;;  %v857_v1 = vmul.f32 10.0, %v841_v32  ;;  %v846_v34 = vsub.f32 8.0, %v830_v14  ;;  %v2947_v54 = vcvt.s32.f32 %v1720_v10  ;;  %v793_v51 = vsub.f32 2.0, %v777_v58 }
 0x1ea   :  { %v889_v23 = vsub.f32 %v1676_v52, %v689_v16  ;;  %v886_v43 = vsub.f32 %v1676_v52, %v683_v18  ;;  %v919_v61 = vsub.f32 %v1888_v53, %v903_v35  ;;  %v916_v4 = vsub.f32 %v1906_v37, %v900_v47 }
 0x1eb   :  { %v827_v50 = vmul.f32 0.5, %v2947_v54  ;;  %v2948_v40 = vmax.f32 %v1860_v25, 1.0  ;;  %v2949_v31 = vmax.f32 %v1866_v33, 1.0  ;;  %v1992_v14 = vadd.f32 %v1806_v59, %v860_v17 }
 0x1ec   :  { %v905_v16 = vmul.f32 %v889_v23, %v1894_v19  ;;  %v902_v18 = vmul.f32 %v886_v43, %v1896_v7  ;;  %v1998_v53 = vsel %vm2936_vm3, %v919_v61, -3.4028235e+38  ;;  %v2002_v37 = vsel %vm2936_vm3, %v916_v4, -3.4028235e+38 }
 0x1ed   :  { %v782_v3 = vmul.f32 %v1956_v41, %v2948_v40  ;;  %v779_v32 = vmul.f32 %v1551_v46, %v2949_v31  ;;  %v693_v25 = vpop.xlane.xlu1 %692  ;;  %v687_v58 = vpop.xlane.xlu0 %686  ;;  %958 = vrot.lane.b32.xlu0 %v1998_v53, %s1570_s1  ;;  %952 = vrot.lane.b32.xlu1 %v2002_v37, %s1570_s1  ;;  %v812_v33 = vmul.f32 %v1545_v28, %v796_v12  ;;  %v843_v7 = vsub.f32 8.0, %v827_v50 }
 0x1ee   :  { %v874_v19 = vadd.f32 %v1806_v59, %v857_v1  ;;  %v2950_v17 = vcvt.s32.f32 %v1729_v15  ;;  %v891_v47 = vsub.f32 %v1676_v52, %v693_v25  ;;  %v888_v54 = vsub.f32 %v1676_v52, %v687_v58 }
 0x1ef   :  { %v921_v23 = vsub.f32 %v1917_v29, %v905_v16  ;;  %v918_v43 = vsub.f32 %v1920_v36, %v902_v18  ;;  %v809_v4 = vmul.f32 %v1547_v24, %v793_v51  ;;  %v798_v40 = vsub.f32 2.0, %v782_v3 }
 0x1f0   :  { %v829_v35 = vmul.f32 0.5, %v2950_v17  ;;  %v795_v31 = vsub.f32 2.0, %v779_v32  ;;  %v2951_v28 = vmax.f32 %v1875_v11, 1.0  ;;  %v907_v1 = vmul.f32 %v891_v47, %v1914_v42 }
 0x1f1   :  { %v1555_v61 = vpop.eup %1554  ;;  %v904_v50 = vmul.f32 %v888_v54, %v1931_v27  ;;  %v2021_v25 = vsel %vm2936_vm3, %v921_v23, -3.4028235e+38  ;;  %v2025_v29 = vsel %vm2936_vm3, %v918_v43, -3.4028235e+38  ;;  %v697_v36 = vpop.xlane.xlu1 %696  ;;  %v862_v11 = vmul.f32 10.0, %v846_v34 }
 0x1f2   :  { %v781_v12 = vmul.f32 %v1553_v57, %v2951_v28  ;;  %v691_v16 = vpop.xlane.xlu0 %690  ;;  %962 = vrot.lane.b32.xlu0 %v2021_v25, %s1570_s1  ;;  %956 = vrot.lane.b32.xlu1 %v2025_v29, %s1570_s1  ;;  %v859_v24 = vmul.f32 10.0, %v843_v7  ;;  %v845_v42 = vsub.f32 8.0, %v829_v35  ;;  %v2952_v27 = vcvt.s32.f32 %v1741_v21 }
 0x1f3   :  { %v893_v3 = vsub.f32 %v1676_v52, %v697_v36  ;;  %v890_v32 = vsub.f32 %v1676_v52, %v691_v16  ;;  %v923_v18 = vsub.f32 %v1961_v2, %v907_v1  ;;  %v920_v58 = vsub.f32 %v1964_v13, %v904_v50 }
 0x1f4   :  { %v831_v51 = vmul.f32 0.5, %v2952_v27  ;;  %v814_v17 = vmul.f32 %v1956_v41, %v798_v40  ;;  %v811_v47 = vmul.f32 %v1551_v46, %v795_v31  ;;  %v797_v54 = vsub.f32 2.0, %v781_v12 }
 0x1f5   :  { %v2953_v23 = vmax.f32 %v1901_v63, 1.0  ;;  %v909_v7 = vmul.f32 %v893_v3, %v812_v33  ;;  %v906_v35 = vmul.f32 %v890_v32, %v809_v4  ;;  %v2042_v43 = vsel %vm2936_vm3, %v923_v18, -3.4028235e+38  ;;  %v701_v2 = vpop.xlane.xlu1 %700 }
 0x1f6   :  { %v2046_v28 = vsel %vm2936_vm3, %v920_v58, -3.4028235e+38  ;;  %v695_v1 = vpop.xlane.xlu0 %694  ;;  %966 = vrot.lane.b32.xlu0 %v2042_v43, %s1570_s1  ;;  %v879_v63 = vadd.f32 %v1806_v59, %v862_v11  ;;  %v876_v41 = vadd.f32 %v1806_v59, %v859_v24  ;;  %v861_v13 = vmul.f32 10.0, %v845_v42 }
 0x1f7   :  { %v783_v34 = vmul.f32 %v1555_v61, %v2953_v23  ;;  %960 = vrot.lane.b32.xlu1 %v2046_v28, %s1570_s1  ;;  %v847_v46 = vsub.f32 8.0, %v831_v51  ;;  %v895_v33 = vsub.f32 %v1676_v52, %v701_v2  ;;  %v892_v4 = vsub.f32 %v1676_v52, %v695_v1 }
 0x1f8   :  { %v925_v40 = vsub.f32 %v1992_v14, %v909_v7  ;;  %v922_v31 = vsub.f32 %v874_v19, %v906_v35  ;;  %v813_v12 = vmul.f32 %v1553_v57, %v797_v54  ;;  %v878_v57 = vadd.f32 %v1806_v59, %v861_v13 }
 0x1f9   :  { %v799_v50 = vsub.f32 2.0, %v783_v34  ;;  %v911_v36 = vmul.f32 %v895_v33, %v814_v17  ;;  %v908_v16 = vmul.f32 %v892_v4, %v811_v47  ;;  %v863_v51 = vmul.f32 10.0, %v847_v46 }
 0x1fa   :  { %v2059_v27 = vsel %vm2936_vm3, %v925_v40, -3.4028235e+38  ;;  %v2063_v11 = vsel %vm2936_vm3, %v922_v31, -3.4028235e+38  ;;  %v699_v24 = vpop.xlane.xlu0 %698 }
 0x1fb   :  { %970 = vrot.lane.b32.xlu0 %v2059_v27, %s1570_s1  ;;  %964 = vrot.lane.b32.xlu1 %v2063_v11, %s1570_s1  ;;  %v894_v14 = vsub.f32 %v1676_v52, %v699_v24  ;;  %v927_v19 = vsub.f32 %v879_v63, %v911_v36  ;;  %v924_v42 = vsub.f32 %v876_v41, %v908_v16 }
 0x1fc   :  { %v815_v32 = vmul.f32 %v1555_v61, %v799_v50  ;;  %v880_v61 = vadd.f32 %v1806_v59, %v863_v51 }
 0x1fd   :  { %v910_v3 = vmul.f32 %v894_v14, %v813_v12  ;;  %v2073_v18 = vsel %vm2936_vm3, %v927_v19, -3.4028235e+38  ;;  %v2077_v58 = vsel %vm2936_vm3, %v924_v42, -3.4028235e+38 }
 0x1fe   :  { %v703_v17 = vpop.xlane.xlu0 %702 }
 0x1ff   :  { %974 = vrot.lane.b32.xlu0 %v2073_v18, %s1570_s1  ;;  %968 = vrot.lane.b32.xlu1 %v2077_v58, %s1570_s1  ;;  %v896_v47 = vsub.f32 %v1676_v52, %v703_v17  ;;  %v926_v54 = vsub.f32 %v878_v57, %v910_v3 }
 0x201   :  { %v912_v23 = vmul.f32 %v896_v47, %v815_v32  ;;  %v2087_v34 = vsel %vm2936_vm3, %v926_v54, -3.4028235e+38 }
 0x203   :  { %972 = vrot.lane.b32.xlu1 %v2087_v34, %s1570_s1  ;;  %v928_v7 = vsub.f32 %v880_v61, %v912_v23 }
 0x205   :  { %v2093_v35 = vsel %vm2936_vm3, %v928_v7, -3.4028235e+38  ;;  %vm1427_vm3 = vcmp.le.s32.totalorder %v1729_v15, %v1629_v26 }
 0x207   :  { %976 = vrot.lane.b32.xlu1 %v2093_v35, %s1570_s1 }
 0x257   :  { %v949_v52 = vpop.permute.xlu0 %948  ;;  %v947_v59 = vpop.permute.xlu1 %946 }
 0x258   :  { %v981_v2 = vsel %vm945_vm9, %v949_v52, -3.4028235e+38  ;;  %v980_v1 = vsel %vm945_vm9, %v947_v59, -3.4028235e+38 }
 0x259   :  { %v2103_v63 = vmax.f32 %v1936_v38, %v981_v2  ;;  %v2106_v41 = vmax.f32 %v1940_v60, %v980_v1 }
 0x25b   :  { %v955_v13 = vpop.permute.xlu0 %954  ;;  %1015 = vrot.lane.b32.xlu1 %v2103_v63, %s1571_s14  ;;  %1013 = vrot.lane.b32.xlu0 %v2106_v41, %s1571_s14  ;;  %v951_v46 = vpop.permute.xlu1 %950 }
 0x25c   :  { %v982_v33 = vsel %vm945_vm9, %v951_v46, -3.4028235e+38  ;;  %v984_v38 = vsel %vm945_vm9, %v955_v13, -3.4028235e+38 }
 0x25d   :  { %v2115_v4 = vmax.f32 %v1974_v20, %v982_v33  ;;  %v2124_v12 = vmax.f32 %v1970_v8, %v984_v38 }
 0x25f   :  { %v959_v60 = vpop.permute.xlu0 %958  ;;  %1017 = vrot.lane.b32.xlu0 %v2115_v4, %s1571_s14  ;;  %v953_v40 = vpop.permute.xlu1 %952 }
 0x260   :  { %v983_v31 = vsel %vm945_vm9, %v953_v40, -3.4028235e+38  ;;  %v986_v20 = vsel %vm945_vm9, %v959_v60, -3.4028235e+38 }
 0x261   :  { %v2127_v50 = vmax.f32 %v2002_v37, %v983_v31  ;;  %v2138_v8 = vmax.f32 %v1998_v53, %v986_v20 }
 0x263   :  { %1021 = vrot.lane.b32.xlu0 %v2124_v12, %s1571_s14  ;;  %1019 = vrot.lane.b32.xlu1 %v2127_v50, %s1571_s14 }
 0x264   :  { %v963_v36 = vpop.permute.xlu0 %962  ;;  %v957_v16 = vpop.permute.xlu1 %956 }
 0x265   :  { %v985_v24 = vsel %vm945_vm9, %v957_v16, -3.4028235e+38  ;;  %v988_v57 = vsel %vm945_vm9, %v963_v36, -3.4028235e+38 }
 0x266   :  { %v2141_v37 = vmax.f32 %v2025_v29, %v985_v24  ;;  %v2152_v53 = vmax.f32 %v2021_v25, %v988_v57 }
 0x267   :  { %1025 = vrot.lane.b32.xlu0 %v2138_v8, %s1571_s14 }
 0x268   :  { %v967_v14 = vpop.permute.xlu0 %966  ;;  %1023 = vrot.lane.b32.xlu1 %v2141_v37, %s1571_s14 }
 0x269   :  { %v961_v19 = vpop.permute.xlu1 %960  ;;  %v990_v51 = vsel %vm945_vm9, %v967_v14, -3.4028235e+38 }
 0x26a   :  { %v987_v42 = vsel %vm945_vm9, %v961_v19, -3.4028235e+38  ;;  %v2166_v25 = vmax.f32 %v2042_v43, %v990_v51 }
 0x26b   :  { %v2155_v29 = vmax.f32 %v2046_v28, %v987_v42  ;;  %1029 = vrot.lane.b32.xlu0 %v2152_v53, %s1571_s14 }
 0x26d   :  { %v971_v3 = vpop.permute.xlu0 %970  ;;  %1027 = vrot.lane.b32.xlu1 %v2155_v29, %s1571_s14  ;;  %v965_v32 = vpop.permute.xlu1 %964 }
 0x26e   :  { %v989_v17 = vsel %vm945_vm9, %v965_v32, -3.4028235e+38  ;;  %v992_v47 = vsel %vm945_vm9, %v971_v3, -3.4028235e+38 }
 0x26f   :  { %v2169_v28 = vmax.f32 %v2063_v11, %v989_v17  ;;  %1033 = vrot.lane.b32.xlu0 %v2166_v25, %s1571_s14  ;;  %v2180_v43 = vmax.f32 %v2059_v27, %v992_v47 }
 0x271   :  { %v975_v54 = vpop.permute.xlu0 %974  ;;  %1031 = vrot.lane.b32.xlu1 %v2169_v28, %s1571_s14  ;;  %v969_v61 = vpop.permute.xlu1 %968 }
 0x272   :  { %v991_v23 = vsel %vm945_vm9, %v969_v61, -3.4028235e+38  ;;  %v994_v7 = vsel %vm945_vm9, %v975_v54, -3.4028235e+38 }
 0x273   :  { %v2183_v11 = vmax.f32 %v2077_v58, %v991_v23  ;;  %1037 = vrot.lane.b32.xlu0 %v2180_v43, %s1571_s14  ;;  %v2194_v2 = vmax.f32 %v2073_v18, %v994_v7 }
 0x275   :  { %1035 = vrot.lane.b32.xlu1 %v2183_v11, %s1571_s14  ;;  %v973_v52 = vpop.permute.xlu1 %972 }
 0x276   :  { %v993_v59 = vsel %vm945_vm9, %v973_v52, -3.4028235e+38 }
 0x277   :  { %v2197_v27 = vmax.f32 %v2087_v34, %v993_v59  ;;  %1041 = vrot.lane.b32.xlu0 %v2194_v2, %s1571_s14 }
 0x279   :  { %1039 = vrot.lane.b32.xlu1 %v2197_v27, %s1571_s14  ;;  %v977_v58 = vpop.permute.xlu1 %976 }
 0x27a   :  { %v995_v1 = vsel %vm945_vm9, %v977_v58, -3.4028235e+38  ;;  %vm1421_vm9 = vcmp.le.s32.totalorder %v1700_v0, %v1629_v26 }
 0x27b   :  { %v2206_v13 = vmax.f32 %v2093_v35, %v995_v1 }
 0x27d   :  { %1043 = vrot.lane.b32.xlu1 %v2206_v13, %s1571_s14 }
 0x2cd   :  { %v1014_v18 = vpop.permute.xlu0 %1013  ;;  %v1016_v34 = vpop.permute.xlu1 %1015 }
 0x2ce   :  { %v1047_v46 = vsel %vm1012_vm10, %v1014_v18, -3.4028235e+38  ;;  %v1048_v33 = vsel %vm1012_vm10, %v1016_v34, -3.4028235e+38 }
 0x2cf   :  { %v2216_v38 = vmax.f32 %v2106_v41, %v1047_v46  ;;  %v2219_v60 = vmax.f32 %v2103_v63, %v1048_v33 }
 0x2d1   :  { %1080 = vrot.lane.b32.xlu0 %v2216_v38, %s1572_s15  ;;  %v1018_v35 = vpop.permute.xlu0 %1017  ;;  %1082 = vrot.lane.b32.xlu1 %v2219_v60, %s1572_s15 }
 0x2d2   :  { %v1049_v40 = vsel %vm1012_vm10, %v1018_v35, -3.4028235e+38 }
 0x2d3   :  { %v2228_v31 = vmax.f32 %v2115_v4, %v1049_v40 }
 0x2d5   :  { %1084 = vrot.lane.b32.xlu0 %v2228_v31, %s1572_s15  ;;  %v1022_v41 = vpop.permute.xlu0 %1021  ;;  %v1020_v63 = vpop.permute.xlu1 %1019 }
 0x2d6   :  { %v1051_v20 = vsel %vm1012_vm10, %v1022_v41, -3.4028235e+38  ;;  %v1050_v36 = vsel %vm1012_vm10, %v1020_v63, -3.4028235e+38 }
 0x2d7   :  { %v2237_v16 = vmax.f32 %v2124_v12, %v1051_v20  ;;  %v2240_v24 = vmax.f32 %v2127_v50, %v1050_v36 }
 0x2d9   :  { %1088 = vrot.lane.b32.xlu0 %v2237_v16, %s1572_s15  ;;  %v1026_v4 = vpop.permute.xlu0 %1025  ;;  %1086 = vrot.lane.b32.xlu1 %v2240_v24, %s1572_s15 }
 0x2da   :  { %v1024_v57 = vpop.permute.xlu1 %1023  ;;  %v1053_v14 = vsel %vm1012_vm10, %v1026_v4, -3.4028235e+38 }
 0x2db   :  { %v1052_v19 = vsel %vm1012_vm10, %v1024_v57, -3.4028235e+38  ;;  %v2251_v12 = vmax.f32 %v2138_v8, %v1053_v14 }
 0x2dc   :  { %v2254_v50 = vmax.f32 %v2141_v37, %v1052_v19 }
 0x2dd   :  { %1092 = vrot.lane.b32.xlu0 %v2251_v12, %s1572_s15  ;;  %v1030_v42 = vpop.permute.xlu0 %1029 }
 0x2de   :  { %1090 = vrot.lane.b32.xlu1 %v2254_v50, %s1572_s15  ;;  %v1055_v3 = vsel %vm1012_vm10, %v1030_v42, -3.4028235e+38 }
 0x2df   :  { %v1028_v51 = vpop.permute.xlu1 %1027  ;;  %v2265_v8 = vmax.f32 %v2152_v53, %v1055_v3 }
 0x2e0   :  { %v1054_v32 = vsel %vm1012_vm10, %v1028_v51, -3.4028235e+38 }
 0x2e1   :  { %v2268_v37 = vmax.f32 %v2155_v29, %v1054_v32  ;;  %1096 = vrot.lane.b32.xlu0 %v2265_v8, %s1572_s15  ;;  %v1034_v17 = vpop.permute.xlu0 %1033 }
 0x2e2   :  { %v1057_v54 = vsel %vm1012_vm10, %v1034_v17, -3.4028235e+38 }
 0x2e3   :  { %1094 = vrot.lane.b32.xlu1 %v2268_v37, %s1572_s15  ;;  %v1032_v47 = vpop.permute.xlu1 %1031  ;;  %v2279_v53 = vmax.f32 %v2166_v25, %v1057_v54 }
 0x2e4   :  { %v1056_v61 = vsel %vm1012_vm10, %v1032_v47, -3.4028235e+38 }
 0x2e5   :  { %v2282_v29 = vmax.f32 %v2169_v28, %v1056_v61  ;;  %1100 = vrot.lane.b32.xlu0 %v2279_v53, %s1572_s15  ;;  %v1038_v23 = vpop.permute.xlu0 %1037 }
 0x2e6   :  { %v1059_v52 = vsel %vm1012_vm10, %v1038_v23, -3.4028235e+38 }
 0x2e7   :  { %1098 = vrot.lane.b32.xlu1 %v2282_v29, %s1572_s15  ;;  %v1036_v7 = vpop.permute.xlu1 %1035  ;;  %v2293_v25 = vmax.f32 %v2180_v43, %v1059_v52 }
 0x2e8   :  { %v1058_v59 = vsel %vm1012_vm10, %v1036_v7, -3.4028235e+38 }
 0x2e9   :  { %v2296_v28 = vmax.f32 %v2183_v11, %v1058_v59  ;;  %1104 = vrot.lane.b32.xlu0 %v2293_v25, %s1572_s15  ;;  %v1042_v58 = vpop.permute.xlu0 %1041 }
 0x2ea   :  { %v1061_v18 = vsel %vm1012_vm10, %v1042_v58, -3.4028235e+38 }
 0x2eb   :  { %1102 = vrot.lane.b32.xlu1 %v2296_v28, %s1572_s15  ;;  %v1040_v1 = vpop.permute.xlu1 %1039  ;;  %v2307_v43 = vmax.f32 %v2194_v2, %v1061_v18 }
 0x2ec   :  { %v1060_v34 = vsel %vm1012_vm10, %v1040_v1, -3.4028235e+38 }
 0x2ed   :  { %v2310_v11 = vmax.f32 %v2197_v27, %v1060_v34  ;;  %1108 = vrot.lane.b32.xlu0 %v2307_v43, %s1572_s15 }
 0x2ef   :  { %1106 = vrot.lane.b32.xlu1 %v2310_v11, %s1572_s15  ;;  %v1044_v46 = vpop.permute.xlu1 %1043 }
 0x2f0   :  { %v1062_v33 = vsel %vm1012_vm10, %v1044_v46, -3.4028235e+38  ;;  %vm1424_vm10 = vcmp.le.s32.totalorder %v1694_v62, %v1629_v26 }
 0x2f1   :  { %v2319_v35 = vmax.f32 %v2206_v13, %v1062_v33 }
 0x2f3   :  { %1110 = vrot.lane.b32.xlu1 %v2319_v35, %s1572_s15 }
 0x343   :  { %v1081_v2 = vpop.permute.xlu0 %1080  ;;  %v1083_v27 = vpop.permute.xlu1 %1082 }
 0x344   :  { %v1114_v40 = vsel %vm1079_vm11, %v1081_v2, -3.4028235e+38  ;;  %v1115_v41 = vsel %vm1079_vm11, %v1083_v27, -3.4028235e+38 }
 0x345   :  { %v2329_v63 = vmax.f32 %v2216_v38, %v1114_v40  ;;  %v2332_v20 = vmax.f32 %v2219_v60, %v1115_v41 }
 0x347   :  { %1147 = vrot.lane.b32.xlu0 %v2329_v63, %s1573_s16  ;;  %v1085_v13 = vpop.permute.xlu0 %1084  ;;  %1149 = vrot.lane.b32.xlu1 %v2332_v20, %s1573_s16 }
 0x348   :  { %v1116_v36 = vsel %vm1079_vm11, %v1085_v13, -3.4028235e+38 }
 0x349   :  { %v2341_v4 = vmax.f32 %v2228_v31, %v1116_v36 }
 0x34b   :  { %1151 = vrot.lane.b32.xlu0 %v2341_v4, %s1573_s16  ;;  %v1089_v38 = vpop.permute.xlu0 %1088  ;;  %v1087_v60 = vpop.permute.xlu1 %1086 }
 0x34c   :  { %v1118_v57 = vsel %vm1079_vm11, %v1089_v38, -3.4028235e+38  ;;  %v1117_v14 = vsel %vm1079_vm11, %v1087_v60, -3.4028235e+38 }
 0x34d   :  { %v2350_v19 = vmax.f32 %v2237_v16, %v1118_v57  ;;  %v2353_v42 = vmax.f32 %v2240_v24, %v1117_v14 }
 0x34f   :  { %1155 = vrot.lane.b32.xlu0 %v2350_v19, %s1573_s16  ;;  %v1093_v31 = vpop.permute.xlu0 %1092  ;;  %1153 = vrot.lane.b32.xlu1 %v2353_v42, %s1573_s16 }
 0x350   :  { %v1091_v51 = vpop.permute.xlu1 %1090  ;;  %v1120_v3 = vsel %vm1079_vm11, %v1093_v31, -3.4028235e+38 }
 0x351   :  { %v1119_v32 = vsel %vm1079_vm11, %v1091_v51, -3.4028235e+38  ;;  %v2364_v16 = vmax.f32 %v2251_v12, %v1120_v3 }
 0x352   :  { %v2367_v24 = vmax.f32 %v2254_v50, %v1119_v32 }
 0x353   :  { %1159 = vrot.lane.b32.xlu0 %v2364_v16, %s1573_s16  ;;  %v1097_v17 = vpop.permute.xlu0 %1096 }
 0x354   :  { %1157 = vrot.lane.b32.xlu1 %v2367_v24, %s1573_s16  ;;  %v1122_v54 = vsel %vm1079_vm11, %v1097_v17, -3.4028235e+38 }
 0x355   :  { %v1095_v47 = vpop.permute.xlu1 %1094  ;;  %v2378_v12 = vmax.f32 %v2265_v8, %v1122_v54 }
 0x356   :  { %v1121_v61 = vsel %vm1079_vm11, %v1095_v47, -3.4028235e+38 }
 0x357   :  { %v2381_v50 = vmax.f32 %v2268_v37, %v1121_v61  ;;  %1163 = vrot.lane.b32.xlu0 %v2378_v12, %s1573_s16  ;;  %v1101_v23 = vpop.permute.xlu0 %1100 }
 0x358   :  { %v1124_v52 = vsel %vm1079_vm11, %v1101_v23, -3.4028235e+38 }
 0x359   :  { %1161 = vrot.lane.b32.xlu1 %v2381_v50, %s1573_s16  ;;  %v1099_v7 = vpop.permute.xlu1 %1098  ;;  %v2392_v8 = vmax.f32 %v2279_v53, %v1124_v52 }
 0x35a   :  { %v1123_v59 = vsel %vm1079_vm11, %v1099_v7, -3.4028235e+38 }
 0x35b   :  { %v2395_v37 = vmax.f32 %v2282_v29, %v1123_v59  ;;  %1167 = vrot.lane.b32.xlu0 %v2392_v8, %s1573_s16  ;;  %v1105_v58 = vpop.permute.xlu0 %1104 }
 0x35c   :  { %v1126_v18 = vsel %vm1079_vm11, %v1105_v58, -3.4028235e+38 }
 0x35d   :  { %1165 = vrot.lane.b32.xlu1 %v2395_v37, %s1573_s16  ;;  %v1103_v1 = vpop.permute.xlu1 %1102  ;;  %v2406_v53 = vmax.f32 %v2293_v25, %v1126_v18 }
 0x35e   :  { %v1125_v34 = vsel %vm1079_vm11, %v1103_v1, -3.4028235e+38 }
 0x35f   :  { %v2409_v29 = vmax.f32 %v2296_v28, %v1125_v34  ;;  %1171 = vrot.lane.b32.xlu0 %v2406_v53, %s1573_s16  ;;  %v1109_v46 = vpop.permute.xlu0 %1108 }
 0x360   :  { %v1128_v2 = vsel %vm1079_vm11, %v1109_v46, -3.4028235e+38 }
 0x361   :  { %1169 = vrot.lane.b32.xlu1 %v2409_v29, %s1573_s16  ;;  %v1107_v33 = vpop.permute.xlu1 %1106  ;;  %v2420_v25 = vmax.f32 %v2307_v43, %v1128_v2 }
 0x362   :  { %v1127_v27 = vsel %vm1079_vm11, %v1107_v33, -3.4028235e+38 }
 0x363   :  { %v2423_v28 = vmax.f32 %v2310_v11, %v1127_v27  ;;  %1175 = vrot.lane.b32.xlu0 %v2420_v25, %s1573_s16 }
 0x365   :  { %1173 = vrot.lane.b32.xlu1 %v2423_v28, %s1573_s16  ;;  %v1111_v40 = vpop.permute.xlu1 %1110 }
 0x366   :  { %v1129_v41 = vsel %vm1079_vm11, %v1111_v40, -3.4028235e+38  ;;  %vm1423_vm11 = vcmp.le.s32.totalorder %v1712_v6, %v1629_v26 }
 0x367   :  { %v2432_v13 = vmax.f32 %v2319_v35, %v1129_v41 }
 0x369   :  { %1177 = vrot.lane.b32.xlu1 %v2432_v13, %s1573_s16 }
 0x3b9   :  { %v1148_v43 = vpop.permute.xlu0 %1147  ;;  %v1150_v11 = vpop.permute.xlu1 %1149 }
 0x3ba   :  { %v1181_v36 = vsel %vm1146_vm12, %v1148_v43, -3.4028235e+38  ;;  %v1182_v38 = vsel %vm1146_vm12, %v1150_v11, -3.4028235e+38 }
 0x3bb   :  { %v2442_v60 = vmax.f32 %v2329_v63, %v1181_v36  ;;  %v2445_v57 = vmax.f32 %v2332_v20, %v1182_v38 }
 0x3bd   :  { %1214 = vrot.lane.b32.xlu0 %v2442_v60, %s1574_s17  ;;  %v1152_v35 = vpop.permute.xlu0 %1151  ;;  %1216 = vrot.lane.b32.xlu1 %v2445_v57, %s1574_s17 }
 0x3be   :  { %v1183_v14 = vsel %vm1146_vm12, %v1152_v35, -3.4028235e+38 }
 0x3bf   :  { %v2454_v31 = vmax.f32 %v2341_v4, %v1183_v14 }
 0x3c1   :  { %1218 = vrot.lane.b32.xlu0 %v2454_v31, %s1574_s17  ;;  %v1156_v63 = vpop.permute.xlu0 %1155  ;;  %v1154_v20 = vpop.permute.xlu1 %1153 }
 0x3c2   :  { %v1185_v51 = vsel %vm1146_vm12, %v1156_v63, -3.4028235e+38  ;;  %v1184_v3 = vsel %vm1146_vm12, %v1154_v20, -3.4028235e+38 }
 0x3c3   :  { %v2463_v32 = vmax.f32 %v2350_v19, %v1185_v51  ;;  %v2466_v17 = vmax.f32 %v2353_v42, %v1184_v3 }
 0x3c5   :  { %1222 = vrot.lane.b32.xlu0 %v2463_v32, %s1574_s17  ;;  %v1160_v4 = vpop.permute.xlu0 %1159  ;;  %1220 = vrot.lane.b32.xlu1 %v2466_v17, %s1574_s17 }
 0x3c6   :  { %v1158_v47 = vpop.permute.xlu1 %1157  ;;  %v1187_v54 = vsel %vm1146_vm12, %v1160_v4, -3.4028235e+38 }
 0x3c7   :  { %v1186_v61 = vsel %vm1146_vm12, %v1158_v47, -3.4028235e+38  ;;  %v2477_v19 = vmax.f32 %v2364_v16, %v1187_v54 }
 0x3c8   :  { %v2480_v42 = vmax.f32 %v2367_v24, %v1186_v61 }
 0x3c9   :  { %1226 = vrot.lane.b32.xlu0 %v2477_v19, %s1574_s17  ;;  %v1164_v23 = vpop.permute.xlu0 %1163 }
 0x3ca   :  { %1224 = vrot.lane.b32.xlu1 %v2480_v42, %s1574_s17  ;;  %v1189_v52 = vsel %vm1146_vm12, %v1164_v23, -3.4028235e+38 }
 0x3cb   :  { %v1162_v7 = vpop.permute.xlu1 %1161  ;;  %v2491_v16 = vmax.f32 %v2378_v12, %v1189_v52 }
 0x3cc   :  { %v1188_v59 = vsel %vm1146_vm12, %v1162_v7, -3.4028235e+38 }
 0x3cd   :  { %v2494_v24 = vmax.f32 %v2381_v50, %v1188_v59  ;;  %1230 = vrot.lane.b32.xlu0 %v2491_v16, %s1574_s17  ;;  %v1168_v58 = vpop.permute.xlu0 %1167 }
 0x3ce   :  { %v1191_v18 = vsel %vm1146_vm12, %v1168_v58, -3.4028235e+38 }
 0x3cf   :  { %1228 = vrot.lane.b32.xlu1 %v2494_v24, %s1574_s17  ;;  %v1166_v1 = vpop.permute.xlu1 %1165  ;;  %v2505_v12 = vmax.f32 %v2392_v8, %v1191_v18 }
 0x3d0   :  { %v1190_v34 = vsel %vm1146_vm12, %v1166_v1, -3.4028235e+38 }
 0x3d1   :  { %v2508_v50 = vmax.f32 %v2395_v37, %v1190_v34  ;;  %1234 = vrot.lane.b32.xlu0 %v2505_v12, %s1574_s17  ;;  %v1172_v46 = vpop.permute.xlu0 %1171 }
 0x3d2   :  { %v1193_v2 = vsel %vm1146_vm12, %v1172_v46, -3.4028235e+38 }
 0x3d3   :  { %1232 = vrot.lane.b32.xlu1 %v2508_v50, %s1574_s17  ;;  %v1170_v33 = vpop.permute.xlu1 %1169  ;;  %v2519_v8 = vmax.f32 %v2406_v53, %v1193_v2 }
 0x3d4   :  { %v1192_v27 = vsel %vm1146_vm12, %v1170_v33, -3.4028235e+38 }
 0x3d5   :  { %v2522_v37 = vmax.f32 %v2409_v29, %v1192_v27  ;;  %1238 = vrot.lane.b32.xlu0 %v2519_v8, %s1574_s17  ;;  %v1176_v40 = vpop.permute.xlu0 %1175 }
 0x3d6   :  { %v1195_v43 = vsel %vm1146_vm12, %v1176_v40, -3.4028235e+38 }
 0x3d7   :  { %1236 = vrot.lane.b32.xlu1 %v2522_v37, %s1574_s17  ;;  %v1174_v41 = vpop.permute.xlu1 %1173  ;;  %v2533_v53 = vmax.f32 %v2420_v25, %v1195_v43 }
 0x3d8   :  { %v1194_v11 = vsel %vm1146_vm12, %v1174_v41, -3.4028235e+38 }
 0x3d9   :  { %v2536_v29 = vmax.f32 %v2423_v28, %v1194_v11  ;;  %1242 = vrot.lane.b32.xlu0 %v2533_v53, %s1574_s17 }
 0x3db   :  { %1240 = vrot.lane.b32.xlu1 %v2536_v29, %s1574_s17  ;;  %v1178_v36 = vpop.permute.xlu1 %1177 }
 0x3dc   :  { %v1196_v38 = vsel %vm1146_vm12, %v1178_v36, -3.4028235e+38  ;;  %vm1425_vm12 = vcmp.le.s32.totalorder %v1720_v10, %v1629_v26 }
 0x3dd   :  { %v2545_v35 = vmax.f32 %v2432_v13, %v1196_v38 }
 0x3df   :  { %1244 = vrot.lane.b32.xlu1 %v2545_v35, %s1574_s17 }
 0x42f   :  { %v1215_v25 = vpop.permute.xlu0 %1214  ;;  %v1217_v28 = vpop.permute.xlu1 %1216 }
 0x430   :  { %v1248_v14 = vsel %vm1213_vm13, %v1215_v25, -3.4028235e+38  ;;  %v1249_v63 = vsel %vm1213_vm13, %v1217_v28, -3.4028235e+38 }
 0x431   :  { %v2555_v20 = vmax.f32 %v2442_v60, %v1248_v14  ;;  %v2558_v51 = vmax.f32 %v2445_v57, %v1249_v63 }
 0x433   :  { %1281 = vrot.lane.b32.xlu0 %v2555_v20, %s1575_s18  ;;  %v1219_v13 = vpop.permute.xlu0 %1218  ;;  %1283 = vrot.lane.b32.xlu1 %v2558_v51, %s1575_s18 }
 0x434   :  { %v1250_v3 = vsel %vm1213_vm13, %v1219_v13, -3.4028235e+38 }
 0x435   :  { %v2567_v4 = vmax.f32 %v2454_v31, %v1250_v3 }
 0x437   :  { %1285 = vrot.lane.b32.xlu0 %v2567_v4, %s1575_s18  ;;  %v1223_v60 = vpop.permute.xlu0 %1222  ;;  %v1221_v57 = vpop.permute.xlu1 %1220 }
 0x438   :  { %v1252_v47 = vsel %vm1213_vm13, %v1223_v60, -3.4028235e+38  ;;  %v1251_v54 = vsel %vm1213_vm13, %v1221_v57, -3.4028235e+38 }
 0x439   :  { %v2576_v61 = vmax.f32 %v2463_v32, %v1252_v47  ;;  %v2579_v23 = vmax.f32 %v2466_v17, %v1251_v54 }
 0x43b   :  { %1289 = vrot.lane.b32.xlu0 %v2576_v61, %s1575_s18  ;;  %v1227_v31 = vpop.permute.xlu0 %1226  ;;  %1287 = vrot.lane.b32.xlu1 %v2579_v23, %s1575_s18 }
 0x43c   :  { %v1225_v7 = vpop.permute.xlu1 %1224  ;;  %v1254_v52 = vsel %vm1213_vm13, %v1227_v31, -3.4028235e+38 }
 0x43d   :  { %v1253_v59 = vsel %vm1213_vm13, %v1225_v7, -3.4028235e+38  ;;  %v2590_v32 = vmax.f32 %v2477_v19, %v1254_v52 }
 0x43e   :  { %v2593_v17 = vmax.f32 %v2480_v42, %v1253_v59 }
 0x43f   :  { %1293 = vrot.lane.b32.xlu0 %v2590_v32, %s1575_s18  ;;  %v1231_v58 = vpop.permute.xlu0 %1230 }
 0x440   :  { %1291 = vrot.lane.b32.xlu1 %v2593_v17, %s1575_s18  ;;  %v1256_v18 = vsel %vm1213_vm13, %v1231_v58, -3.4028235e+38 }
 0x441   :  { %v1229_v1 = vpop.permute.xlu1 %1228  ;;  %v2604_v19 = vmax.f32 %v2491_v16, %v1256_v18 }
 0x442   :  { %v1255_v34 = vsel %vm1213_vm13, %v1229_v1, -3.4028235e+38 }
 0x443   :  { %v2607_v42 = vmax.f32 %v2494_v24, %v1255_v34  ;;  %1297 = vrot.lane.b32.xlu0 %v2604_v19, %s1575_s18  ;;  %v1235_v46 = vpop.permute.xlu0 %1234 }
 0x444   :  { %v1258_v2 = vsel %vm1213_vm13, %v1235_v46, -3.4028235e+38 }
 0x445   :  { %1295 = vrot.lane.b32.xlu1 %v2607_v42, %s1575_s18  ;;  %v1233_v33 = vpop.permute.xlu1 %1232  ;;  %v2618_v16 = vmax.f32 %v2505_v12, %v1258_v2 }
 0x446   :  { %v1257_v27 = vsel %vm1213_vm13, %v1233_v33, -3.4028235e+38 }
 0x447   :  { %v2621_v24 = vmax.f32 %v2508_v50, %v1257_v27  ;;  %1301 = vrot.lane.b32.xlu0 %v2618_v16, %s1575_s18  ;;  %v1239_v40 = vpop.permute.xlu0 %1238 }
 0x448   :  { %v1260_v43 = vsel %vm1213_vm13, %v1239_v40, -3.4028235e+38 }
 0x449   :  { %1299 = vrot.lane.b32.xlu1 %v2621_v24, %s1575_s18  ;;  %v1237_v41 = vpop.permute.xlu1 %1236  ;;  %v2632_v12 = vmax.f32 %v2519_v8, %v1260_v43 }
 0x44a   :  { %v1259_v11 = vsel %vm1213_vm13, %v1237_v41, -3.4028235e+38 }
 0x44b   :  { %v2635_v50 = vmax.f32 %v2522_v37, %v1259_v11  ;;  %1305 = vrot.lane.b32.xlu0 %v2632_v12, %s1575_s18  ;;  %v1243_v36 = vpop.permute.xlu0 %1242 }
 0x44c   :  { %v1262_v25 = vsel %vm1213_vm13, %v1243_v36, -3.4028235e+38 }
 0x44d   :  { %1303 = vrot.lane.b32.xlu1 %v2635_v50, %s1575_s18  ;;  %v1241_v38 = vpop.permute.xlu1 %1240  ;;  %v2646_v8 = vmax.f32 %v2533_v53, %v1262_v25 }
 0x44e   :  { %v1261_v28 = vsel %vm1213_vm13, %v1241_v38, -3.4028235e+38 }
 0x44f   :  { %v2649_v37 = vmax.f32 %v2536_v29, %v1261_v28  ;;  %1309 = vrot.lane.b32.xlu0 %v2646_v8, %s1575_s18 }
 0x451   :  { %1307 = vrot.lane.b32.xlu1 %v2649_v37, %s1575_s18  ;;  %v1245_v14 = vpop.permute.xlu1 %1244 }
 0x452   :  { %v1263_v63 = vsel %vm1213_vm13, %v1245_v14, -3.4028235e+38  ;;  %vm1426_vm13 = vcmp.le.s32.totalorder %v1709_v5, %v1629_v26 }
 0x453   :  { %v2658_v13 = vmax.f32 %v2545_v35, %v1263_v63 }
 0x455   :  { %1311 = vrot.lane.b32.xlu1 %v2658_v13, %s1575_s18 }
 0x4a5   :  { %v1282_v53 = vpop.permute.xlu0 %1281  ;;  %v1284_v29 = vpop.permute.xlu1 %1283 }
 0x4a6   :  { %v1315_v3 = vsel %vm1280_vm14, %v1282_v53, -3.4028235e+38  ;;  %v1316_v60 = vsel %vm1280_vm14, %v1284_v29, -3.4028235e+38 }
 0x4a7   :  { %v2668_v57 = vmax.f32 %v2555_v20, %v1315_v3  ;;  %v2671_v47 = vmax.f32 %v2558_v51, %v1316_v60 }
 0x4a9   :  { %1348 = vrot.lane.b32.xlu0 %v2668_v57, %s1576_s19  ;;  %v1286_v35 = vpop.permute.xlu0 %1285  ;;  %1350 = vrot.lane.b32.xlu1 %v2671_v47, %s1576_s19 }
 0x4aa   :  { %v1317_v54 = vsel %vm1280_vm14, %v1286_v35, -3.4028235e+38 }
 0x4ab   :  { %v2680_v31 = vmax.f32 %v2567_v4, %v1317_v54 }
 0x4ad   :  { %1352 = vrot.lane.b32.xlu0 %v2680_v31, %s1576_s19  ;;  %v1290_v20 = vpop.permute.xlu0 %1289  ;;  %v1288_v51 = vpop.permute.xlu1 %1287 }
 0x4ae   :  { %v1319_v7 = vsel %vm1280_vm14, %v1290_v20, -3.4028235e+38  ;;  %v1318_v52 = vsel %vm1280_vm14, %v1288_v51, -3.4028235e+38 }
 0x4af   :  { %v2689_v59 = vmax.f32 %v2576_v61, %v1319_v7  ;;  %v2692_v58 = vmax.f32 %v2579_v23, %v1318_v52 }
 0x4b1   :  { %1356 = vrot.lane.b32.xlu0 %v2689_v59, %s1576_s19  ;;  %v1294_v4 = vpop.permute.xlu0 %1293  ;;  %1354 = vrot.lane.b32.xlu1 %v2692_v58, %s1576_s19 }
 0x4b2   :  { %v1292_v1 = vpop.permute.xlu1 %1291  ;;  %v1321_v18 = vsel %vm1280_vm14, %v1294_v4, -3.4028235e+38 }
 0x4b3   :  { %v1320_v34 = vsel %vm1280_vm14, %v1292_v1, -3.4028235e+38  ;;  %v2703_v61 = vmax.f32 %v2590_v32, %v1321_v18 }
 0x4b4   :  { %v2706_v23 = vmax.f32 %v2593_v17, %v1320_v34 }
 0x4b5   :  { %1360 = vrot.lane.b32.xlu0 %v2703_v61, %s1576_s19  ;;  %v1298_v46 = vpop.permute.xlu0 %1297 }
 0x4b6   :  { %1358 = vrot.lane.b32.xlu1 %v2706_v23, %s1576_s19  ;;  %v1323_v2 = vsel %vm1280_vm14, %v1298_v46, -3.4028235e+38 }
 0x4b7   :  { %v1296_v33 = vpop.permute.xlu1 %1295  ;;  %v2717_v32 = vmax.f32 %v2604_v19, %v1323_v2 }
 0x4b8   :  { %v1322_v27 = vsel %vm1280_vm14, %v1296_v33, -3.4028235e+38 }
 0x4b9   :  { %v2720_v17 = vmax.f32 %v2607_v42, %v1322_v27  ;;  %1364 = vrot.lane.b32.xlu0 %v2717_v32, %s1576_s19  ;;  %v1302_v40 = vpop.permute.xlu0 %1301 }
 0x4ba   :  { %v1325_v43 = vsel %vm1280_vm14, %v1302_v40, -3.4028235e+38 }
 0x4bb   :  { %1362 = vrot.lane.b32.xlu1 %v2720_v17, %s1576_s19  ;;  %v1300_v41 = vpop.permute.xlu1 %1299  ;;  %v2731_v19 = vmax.f32 %v2618_v16, %v1325_v43 }
 0x4bc   :  { %v1324_v11 = vsel %vm1280_vm14, %v1300_v41, -3.4028235e+38 }
 0x4bd   :  { %v2734_v42 = vmax.f32 %v2621_v24, %v1324_v11  ;;  %1368 = vrot.lane.b32.xlu0 %v2731_v19, %s1576_s19  ;;  %v1306_v36 = vpop.permute.xlu0 %1305 }
 0x4be   :  { %v1327_v25 = vsel %vm1280_vm14, %v1306_v36, -3.4028235e+38 }
 0x4bf   :  { %1366 = vrot.lane.b32.xlu1 %v2734_v42, %s1576_s19  ;;  %v1304_v38 = vpop.permute.xlu1 %1303  ;;  %v2745_v16 = vmax.f32 %v2632_v12, %v1327_v25 }
 0x4c0   :  { %v1326_v28 = vsel %vm1280_vm14, %v1304_v38, -3.4028235e+38 }
 0x4c1   :  { %v2748_v24 = vmax.f32 %v2635_v50, %v1326_v28  ;;  %1372 = vrot.lane.b32.xlu0 %v2745_v16, %s1576_s19  ;;  %v1310_v14 = vpop.permute.xlu0 %1309 }
 0x4c2   :  { %v1329_v53 = vsel %vm1280_vm14, %v1310_v14, -3.4028235e+38 }
 0x4c3   :  { %1370 = vrot.lane.b32.xlu1 %v2748_v24, %s1576_s19  ;;  %v1308_v63 = vpop.permute.xlu1 %1307  ;;  %v2759_v12 = vmax.f32 %v2646_v8, %v1329_v53 }
 0x4c4   :  { %v1328_v29 = vsel %vm1280_vm14, %v1308_v63, -3.4028235e+38 }
 0x4c5   :  { %v2762_v50 = vmax.f32 %v2649_v37, %v1328_v29  ;;  %1376 = vrot.lane.b32.xlu0 %v2759_v12, %s1576_s19 }
 0x4c7   :  { %1374 = vrot.lane.b32.xlu1 %v2762_v50, %s1576_s19  ;;  %v1312_v3 = vpop.permute.xlu1 %1311 }
 0x4c8   :  { %v1330_v60 = vsel %vm1280_vm14, %v1312_v3, -3.4028235e+38  ;;  %vm1428_vm14 = vcmp.le.s32.totalorder %v1717_v9, %v1629_v26 }
 0x4c9   :  { %v2771_v35 = vmax.f32 %v2658_v13, %v1330_v60 }
 0x4cb   :  { %1378 = vrot.lane.b32.xlu1 %v2771_v35, %s1576_s19 }
 0x51b   :  { %v1349_v8 = vpop.permute.xlu0 %1348  ;;  %v1351_v54 = vpop.permute.xlu1 %1350 }
 0x51c   :  { %v1382_v13 = vsel %vm1347_vm15, %v1349_v8, -3.4028235e+38  ;;  %v1383_v18 = vsel %vm1347_vm15, %v1351_v54, -3.4028235e+38 }
 0x51d   :  { %v1398_v40 = vmax.f32 %v2668_v57, %v1382_v13  ;;  %v1399_v41 = vmax.f32 %v2671_v47, %v1383_v18 }
 0x51f   :  { %v1353_v37 = vpop.permute.xlu0 %1352 }
 0x520   :  { %v1384_v11 = vsel %vm1347_vm15, %v1353_v37, -3.4028235e+38 }
 0x521   :  { %v1400_v3 = vmax.f32 %v2680_v31, %v1384_v11 }
 0x523   :  { %v1357_v20 = vpop.permute.xlu0 %1356  ;;  %v1355_v51 = vpop.permute.xlu1 %1354 }
 0x524   :  { %v1386_v34 = vsel %vm1347_vm15, %v1357_v20, -3.4028235e+38  ;;  %v1385_v57 = vsel %vm1347_vm15, %v1355_v51, -3.4028235e+38  ;;  %v1432_v51 = vsel %vm1416_vm5, %v1400_v3, 3.4028235e+38 }
 0x525   :  { %v1402_v36 = vmax.f32 %v2689_v59, %v1386_v34  ;;  %v1401_v8 = vmax.f32 %v2692_v58, %v1385_v57  ;;  %v1467_v57 = vsub.f32 8.0, %v1752_v30 }
 0x527   :  { %v1361_v7 = vpop.permute.xlu0 %1360  ;;  %v1434_v60 = vsel %vm1418_vm2, %v1402_v36, 3.4028235e+38 }
 0x528   :  { %v1359_v52 = vpop.permute.xlu1 %1358  ;;  %v1388_v2 = vsel %vm1347_vm15, %v1361_v7, -3.4028235e+38  ;;  %v1433_v7 = vsel %vm1417_vm6, %v1401_v8, 3.4028235e+38 }
 0x529   :  { %v1387_v27 = vsel %vm1347_vm15, %v1359_v52, -3.4028235e+38  ;;  %v1404_v47 = vmax.f32 %v2703_v61, %v1388_v2  ;;  %v1430_v61 = vsel %vm1414_vm0, %v1398_v40, 3.4028235e+38  ;;  %vm1429_vm0 = vcmp.le.s32.totalorder %v1741_v21, %v1629_v26 }
 0x52a   :  { %v1403_v25 = vmax.f32 %v2706_v23, %v1387_v27  ;;  %v1431_v23 = vsel %vm1415_vm1, %v1399_v41, 3.4028235e+38 }
 0x52b   :  { %v1365_v4 = vpop.permute.xlu0 %1364  ;;  %v1436_v39 = vsel %vm1420_vm4, %v1404_v47, 3.4028235e+38  ;;  %v1470_v47 = vadd.f32 1.0, %v1752_v30 }
 0x52c   :  { %v1390_v28 = vsel %vm1347_vm15, %v1365_v4, -3.4028235e+38  ;;  %v1435_v31 = vsel %vm1419_vm7, %v1403_v25, 3.4028235e+38  ;;  %v1446_v4 = vmin.f32 %v1430_v61, %v1434_v60 }
 0x52d   :  { %v1363_v1 = vpop.permute.xlu1 %1362  ;;  %v1406_v54 = vmax.f32 %v2717_v32, %v1390_v28  ;;  %v1447_v52 = vmin.f32 %v1431_v23, %v1435_v31  ;;  %v1468_v28 = vmul.f32 10.0, %v1467_v57 }
 0x52e   :  { %v1389_v43 = vsel %vm1347_vm15, %v1363_v1, -3.4028235e+38 }
 0x52f   :  { %v1369_v46 = vpop.permute.xlu0 %1368  ;;  %v1405_v63 = vmax.f32 %v2720_v17, %v1389_v43  ;;  %v1438_v6 = vsel %vm1422_vm8, %v1406_v54, 3.4028235e+38 }
 0x530   :  { %v1392_v53 = vsel %vm1347_vm15, %v1369_v46, -3.4028235e+38  ;;  %v1450_v34 = vmin.f32 %v1446_v4, %v1438_v6 }
 0x531   :  { %v1367_v33 = vpop.permute.xlu1 %1366  ;;  %v1437_v58 = vsel %vm1421_vm9, %v1405_v63, 3.4028235e+38 }
 0x532   :  { %v1391_v38 = vsel %vm1347_vm15, %v1367_v33, -3.4028235e+38  ;;  %v1449_v1 = vmin.f32 %v1433_v7, %v1437_v58 }
 0x533   :  { %v1373_v59 = vpop.permute.xlu0 %1372  ;;  %v1407_v17 = vmax.f32 %v2734_v42, %v1391_v38  ;;  %v1408_v42 = vmax.f32 %v2731_v19, %v1392_v53 }
 0x534   :  { %v1394_v22 = vsel %vm1347_vm15, %v1373_v59, -3.4028235e+38 }
 0x535   :  { %v1371_v14 = vpop.permute.xlu1 %1370  ;;  %v1439_v56 = vsel %vm1423_vm11, %v1407_v17, 3.4028235e+38  ;;  %v1410_v19 = vmax.f32 %v2745_v16, %v1394_v22  ;;  %v1440_v16 = vsel %vm1424_vm10, %v1408_v42, 3.4028235e+38 }
 0x536   :  { %v1393_v29 = vsel %vm1347_vm15, %v1371_v14, -3.4028235e+38  ;;  %v1451_v13 = vmin.f32 %v1447_v52, %v1439_v56  ;;  %v1471_v14 = vmul.f32 0.125, %v1470_v47 }
 0x537   :  { %v1409_v44 = vmax.f32 %v2748_v24, %v1393_v29  ;;  %v1377_v37 = vpop.permute.xlu0 %1376  ;;  %v1442_v62 = vsel %vm1426_vm13, %v1410_v19, 3.4028235e+38 }
 0x538   :  { %v1396_v32 = vsel %vm1347_vm15, %v1377_v37, -3.4028235e+38  ;;  %v1454_v27 = vmin.f32 %v1450_v34, %v1442_v62 }
 0x539   :  { %v1375_v20 = vpop.permute.xlu1 %1374  ;;  %v1412_v24 = vmax.f32 %v2759_v12, %v1396_v32  ;;  %v1441_v12 = vsel %vm1425_vm12, %v1409_v44, 3.4028235e+38 }
 0x53a   :  { %v1395_v48 = vsel %vm1347_vm15, %v1375_v20, -3.4028235e+38  ;;  %v1453_v46 = vmin.f32 %v1449_v1, %v1441_v12 }
 0x53b   :  { %v1411_v0 = vmax.f32 %v2762_v50, %v1395_v48  ;;  %v1448_v50 = vmin.f32 %v1432_v51, %v1436_v39  ;;  %v1444_v10 = vsel %vm1428_vm14, %v1412_v24, 3.4028235e+38 }
 0x53d   :  { %v1443_v45 = vsel %vm1427_vm3, %v1411_v0, 3.4028235e+38  ;;  %v1379_v49 = vpop.permute.xlu1 %1378  ;;  %v1452_v15 = vmin.f32 %v1448_v50, %v1440_v16  ;;  %vm2954_vm3 = vcmp.lt.s32.totalorder %v1629_v26, 8 }
 0x53e   :  { %v1397_v55 = vsel %vm1347_vm15, %v1379_v49, -3.4028235e+38  ;;  %v1455_v33 = vmin.f32 %v1451_v13, %v1443_v45 }
 0x53f   :  { %v1413_v18 = vmax.f32 %v2771_v35, %v1397_v55  ;;  %v1456_v40 = vmin.f32 %v1452_v15, %v1444_v10 }
 0x540   :  { %v1458_v43 = vmin.f32 %v1454_v27, %v1455_v33 }
 0x541   :  { %v1445_v2 = vsel %vm1429_vm0, %v1413_v18, 3.4028235e+38 }
 0x542   :  { %v1457_v41 = vmin.f32 %v1453_v46, %v1445_v2 }
 0x544   :  { %v1459_v5 = vmin.f32 %v1456_v40, %v1457_v41 }
 0x546   :  { %v1460_v11 = vmin.f32 %v1458_v43, %v1459_v5 }
 0x548   :  { %v1461_v36 = vrot.slane %v1460_v11, 4 }
 0x54a   :  { %v1462_v38 = vmin.f32 %v1460_v11, %v1461_v36 }
 0x54c   :  { %v1463_v9 = vrot.slane %v1462_v38, 2 }
 0x54e   :  { %v1464_v35 = vmin.f32 %v1462_v38, %v1463_v9 }
 0x550   :  { %v1465_v25 = vrot.slane %v1464_v35, 1 }
 0x552   :  { %v1466_v59 = vmin.f32 %v1464_v35, %v1465_v25 }
 0x554   :  { %v1469_v21 = vsub.f32 %v1466_v59, %v1468_v28 }
 0x556   :  { %v1472_v63 = vsub.f32 %v1471_v14, %v1469_v21 }
 0x558   :  { %v1473_v53 = vand.u32 2147483647, %v1472_v63 }
 0x55a   :  { %v1474_v29 = vsel %vm2954_vm3, %v1473_v53, 0.0 }
 0x55b   :  { %1475 = vmax.xlane.f32.xlu0 %v1474_v29 }
 0x5e8   :  { %v1476_v61 = vpop.xlane.xlu0 %1475 }
 0x5e9   :  { %1510 = vpush %v1476_v61 }
 0x61a   :  { %s1511_s20 = spop %1510 }
 0x61b   :  { %1479 = sst [smem:[#allocation2]] %s1511_s20 }
 0x61c   :  { %1565 = shalt.err (!%p1562_p2)
}
 0x61d   :  { %s1577_s28 = smov [#allocation2]  }
 0x61e   :  { %1487 = dma.smem_to_hbm %s1577_s28, 16, %s2922_s2, [#allocation3]  }
 0x61f   :  { %1566 = dma.done.wait [#allocation3], 16  }
 0x620   :  { %1567 = vsyncadd [#allocation3], 4294967280 }
 0x621   :  { %1491 = sfence }
 0x622   :  { %1492 = vsyncpa [#allocation3], 1 }

</bundles_post_ra>
